<compile_context>
chip_gen: v7x
topology: tpu7x:2x2x1
jax: 0.10.0
libtpu: 0.0.40
codegen_flags: <defaults>
</compile_context>

<pallas_src>
import functools

import jax
import jax.numpy as jnp
from jax.experimental import pallas as pl
from jax.experimental.pallas import tpu as pltpu


_BN_EPS = 1e-5


def _fold_bn(gamma, beta, mean, var, eps=_BN_EPS):
    """Fold eval-mode BatchNorm into a per-channel scale/bias."""
    scale = gamma / jnp.sqrt(var + eps)
    return scale, beta - mean * scale


def _round_up(x, m):
    return ((x + m - 1) // m) * m


# ---------------------------------------------------------------------------
# Single fused kernel: deconv(+BN0+LReLU) -> interleave into VMEM -> conv1 over
# the virtual [up, skip] concat (+BN1+LReLU) -> conv2 (+BN2+LReLU) -> NCHW out.
#
# Activation buffers are (C, L) with flattened spatial in lanes.  The stage-2
# buffers hold the Hp x Wp image with row stride Wp starting at offset
# base = Wp + 1 (one zero "halo" row above/below plus 1 element of slack), so a
# 3x3 'same' conv tap (dy, dx) is the contiguous window buf[:, s : s + Hp*Wp]
# with s = dy*Wp + dx.  Row-wrap artifacts of this flattened addressing only hit
# output column 0 (for dx=0 taps) and column Wp-1 (for dx=2 taps) and are removed
# with two precomputed column masks per conv.
# ---------------------------------------------------------------------------
def _decoder_fused_kernel(x_ref, skip_ref, wd_ref, w1u_ref, w1s_ref, w2_ref,
                          b0_ref, b1_ref, b2_ref, se_ref, so_ref,
                          mx_ref, ml_ref, mr_ref,
                          o_ref,
                          x_buf, up_buf, skip_buf, mid_buf):
    # x_ref:    (1, C_in,  H*W)        deconv input, channel-major (from NCHW)
    # skip_ref: (1, C_skip, Hp*Wp)     skip branch, channel-major
    # wd_ref:   (3, 3, C_out, C_in)    deconv taps [ky, kx, co, ci], BN0 scale folded
    # w1u/w1s:  (3, 3, C_mid, C_out/C_skip)  conv1 taps split per concat source
    # w2_ref:   (3, 3, C_out, C_mid)   conv2 taps
    # b0/b1/b2: (C, 1) f32             folded BatchNorm biases
    # se/so:    (W, Wp) 0/1            column-interleave scatter matrices
    # mx:       (1, H*W)  f32          zero where input col == W-1 (deconv wrap mask)
    # ml/mr:    (1, Hp*Wp) f32         zero at output col 0 / col Wp-1 (conv wrap masks)
    # o_ref:    (1, C_out, Hp*Wp)      channel-major output (NCHW, lane-dense)
    C_in = x_ref.shape[1]
    HW = x_ref.shape[2]
    C_skip = skip_ref.shape[1]
    C_out = o_ref.shape[1]
    C_mid = w1u_ref.shape[2]
    W = se_ref.shape[0]
    Wp = se_ref.shape[1]
    H = HW // W
    HWp = o_ref.shape[2]                     # == (2H) * (2W)
    base = Wp + 1                            # first real element in stage-2 buffers
    Lx = x_buf.shape[1]
    Lb = up_buf.shape[1]

    # ---- halo / slack zeroing: O(perimeter) per step (interior rewritten below).
    x_buf[:, HW:Lx] = jnp.zeros((C_in, Lx - HW), x_buf.dtype)
    up_buf[:, 0:base] = jnp.zeros((C_out, base), up_buf.dtype)
    up_buf[:, base + HWp:Lb] = jnp.zeros((C_out, Lb - base - HWp), up_buf.dtype)
    skip_buf[:, 0:base] = jnp.zeros((C_skip, base), skip_buf.dtype)
    skip_buf[:, base + HWp:Lb] = jnp.zeros((C_skip, Lb - base - HWp), skip_buf.dtype)
    mid_buf[:, 0:base] = jnp.zeros((C_mid, base), mid_buf.dtype)
    mid_buf[:, base + HWp:Lb] = jnp.zeros((C_mid, Lb - base - HWp), mid_buf.dtype)

    # ---- stage 1: ConvTranspose2d(k3, s2, p1, op1) by output-pixel parity ------
    x_buf[:, 0:HW] = x_ref[0].astype(x_buf.dtype)

    x00 = x_buf[:, 0:HW]                     # x[i,   j  ]
    x01 = x_buf[:, 1:1 + HW]                 # x[i,   j+1]  (wraps at j=W-1 -> mx)
    x10 = x_buf[:, W:W + HW]                 # x[i+1, j  ]  (reads zero tail at i=H-1)
    x11 = x_buf[:, W + 1:W + 1 + HW]         # x[i+1, j+1]

    def dmm(win, ky, kx):
        return jnp.dot(wd_ref[ky, kx], win, preferred_element_type=jnp.float32)

    mx = mx_ref[...]
    b0 = b0_ref[...]

    # up[2i+py, 2j+px] for the stride-2, k=3, p=1, output_padding=1 deconv:
    e_ee = dmm(x00, 1, 1)                                            # (even, even)
    e_eo = dmm(x00, 1, 2) + mx * dmm(x01, 1, 0)                      # (even, odd)
    e_oe = dmm(x00, 2, 1) + dmm(x10, 0, 1)                           # (odd,  even)
    e_oo = (dmm(x00, 2, 2) + dmm(x10, 0, 2)
            + mx * (dmm(x01, 2, 0) + dmm(x11, 0, 0)))                # (odd,  odd)

    def act0(v):                              # folded-BN bias + LeakyReLU(0.2)
        v = v + b0
        return jnp.where(v > 0, v, 0.2 * v).astype(up_buf.dtype)

    y_ee, y_eo = act0(e_ee), act0(e_eo)
    y_oe, y_oo = act0(e_oe), act0(e_oo)

    se = se_ref[...]
    so = so_ref[...]

    # Stride-2 interleave straight into the padded conv1 input (VMEM only):
    # column interleave via constant 0/1 scatter matmuls, rows via dense stores.
    # TODO(synk): fori_loop / strided block store for large H.
    for i in range(H):
        sl = slice(i * W, (i + 1) * W)
        r_even = (jnp.dot(y_ee[:, sl], se, preferred_element_type=jnp.float32)
                  + jnp.dot(y_eo[:, sl], so, preferred_element_type=jnp.float32))
        r_odd = (jnp.dot(y_oe[:, sl], se, preferred_element_type=jnp.float32)
                 + jnp.dot(y_oo[:, sl], so, preferred_element_type=jnp.float32))
        o_e = base + (2 * i) * Wp
        o_o = base + (2 * i + 1) * Wp
        up_buf[:, o_e:o_e + Wp] = r_even.astype(up_buf.dtype)
        up_buf[:, o_o:o_o + Wp] = r_odd.astype(up_buf.dtype)

    # ---- stage 2: fused DoubleConv over the virtual concat [up, skip] ----------
    # (the concat is never materialized: conv1's weight is split per source)
    skip_buf[:, base:base + HWp] = skip_ref[0].astype(skip_buf.dtype)

    ml = ml_ref[...]
    mr = mr_ref[...]
    b1 = b1_ref[...]
    b2 = b2_ref[...]

    def c1(dy, dx):
        s = dy * Wp + dx
        return (jnp.dot(w1u_ref[dy, dx], up_buf[:, s:s + HWp],
                        preferred_element_type=jnp.float32)
                + jnp.dot(w1s_ref[dy, dx], skip_buf[:, s:s + HWp],
                          preferred_element_type=jnp.float32))

    a_l = c1(0, 0) + c1(1, 0) + c1(2, 0)      # dx=0 taps -> garbage at col 0
    a_c = c1(0, 1) + c1(1, 1) + c1(2, 1)
    a_r = c1(0, 2) + c1(1, 2) + c1(2, 2)      # dx=2 taps -> garbage at col Wp-1
    y1 = ml * a_l + a_c + mr * a_r + b1
    y1 = jnp.where(y1 > 0, y1, 0.2 * y1)
    mid_buf[:, base:base + HWp] = y1.astype(mid_buf.dtype)

    def c2(dy, dx):
        s = dy * Wp + dx
        return jnp.dot(w2_ref[dy, dx], mid_buf[:, s:s + HWp],
                       preferred_element_type=jnp.float32)

    a2_l = c2(0, 0) + c2(1, 0) + c2(2, 0)
    a2_c = c2(0, 1) + c2(1, 1) + c2(2, 1)
    a2_r = c2(0, 2) + c2(1, 2) + c2(2, 2)
    y2 = ml * a2_l + a2_c + mr * a2_r + b2
    y2 = jnp.where(y2 > 0, y2, 0.2 * y2)
    o_ref[0] = y2.astype(o_ref.dtype)         # lane-dense (Hp*Wp) NCHW store


# ---------------------------------------------------------------------------
# Wrapper
# ---------------------------------------------------------------------------
def _decoder_pallas(x_nchw, skip_nchw, params, compute_dtype):
    N, C_in, H, W = x_nchw.shape
    C_out = params["w_deconv"].shape[1]
    C_skip = skip_nchw.shape[1]
    C_mid = params["w1"].shape[0]
    Hp, Wp = 2 * H, 2 * W
    HW, HWp = H * W, Hp * Wp

    # fold all three BatchNorms (eval / running-stats semantics)
    s0, b0 = _fold_bn(params["bn0_gamma"], params["bn0_beta"],
                      params["bn0_mean"], params["bn0_var"])
    s1, b1 = _fold_bn(params["bn1_gamma"], params["bn1_beta"],
                      params["bn1_mean"], params["bn1_var"])
    s2, b2 = _fold_bn(params["bn2_gamma"], params["bn2_beta"],
                      params["bn2_mean"], params["bn2_var"])

    # NCHW is already channel-major / spatial-minor: only free reshapes, no transposes.
    x2d = x_nchw.reshape(N, C_in, HW)
    skip2d = skip_nchw.reshape(N, C_skip, HWp)

    # Weights: tap-major [ky, kx, C_out, C_in] with the BN scale folded in.
    wd = jnp.transpose(params["w_deconv"], (2, 3, 1, 0)) * s0[None, None, :, None]
    w1 = jnp.transpose(params["w1"], (2, 3, 0, 1)) * s1[None, None, :, None]
    w2 = jnp.transpose(params["w2"], (2, 3, 0, 1)) * s2[None, None, :, None]
    wd = wd.astype(compute_dtype)
    w1u = w1[:, :, :, :C_out].astype(compute_dtype)       # concat source: up
    w1s = w1[:, :, :, C_out:].astype(compute_dtype)       # concat source: skip
    w2 = w2.astype(compute_dtype)

    b0_ = b0.reshape(C_out, 1).astype(jnp.float32)
    b1_ = b1.reshape(C_mid, 1).astype(jnp.float32)
    b2_ = b2.reshape(C_out, 1).astype(jnp.float32)

    # constant 0/1 column-interleave (depth-to-space) scatter matrices
    rows = jnp.arange(W)
    cols = jnp.arange(Wp)
    se = (cols[None, :] == 2 * rows[:, None]).astype(compute_dtype)
    so = (cols[None, :] == 2 * rows[:, None] + 1).astype(compute_dtype)

    # row-wrap masks for the flattened shifted-window convolutions
    jx = jnp.arange(HW) % W
    mx = (jx != W - 1).astype(jnp.float32).reshape(1, HW)
    jp = jnp.arange(HWp) % Wp
    ml = (jp != 0).astype(jnp.float32).reshape(1, HWp)
    mr = (jp != Wp - 1).astype(jnp.float32).reshape(1, HWp)

    # scratch lane lengths (with top/bottom halo + slack, rounded up)
    Lx = _round_up(HW + W + 2, 128)
    Lb = _round_up(HWp + 2 * Wp + 2, 128)

    # per-step VMEM footprint -> explicit scoped-VMEM budget (review: derive it)
    cdb = jnp.dtype(compute_dtype).itemsize
    in_bytes = (C_in * HW * x_nchw.dtype.itemsize
                + C_skip * HWp * skip_nchw.dtype.itemsize)
    out_bytes = C_out * HWp * cdb
    const_bytes = ((wd.size + w1u.size + w1s.size + w2.size + se.size + so.size) * cdb
                   + (b0_.size + b1_.size + b2_.size + mx.size + ml.size + mr.size) * 4)
    scratch_bytes = (C_in * Lx + (C_out + C_skip + C_mid) * Lb) * cdb
    vmem_limit = int(min(64 * 1024 * 1024,
                         max(16 * 1024 * 1024,
                             2 * (in_bytes + out_bytes + const_bytes)
                             + scratch_bytes + 4 * 1024 * 1024)))

    out2d = pl.pallas_call(
        _decoder_fused_kernel,
        out_shape=jax.ShapeDtypeStruct((N, C_out, HWp), compute_dtype),
        grid_spec=pltpu.PrefetchScalarGridSpec(
            num_scalar_prefetch=0,
            grid=(N,),
            in_specs=[
                pl.BlockSpec((1, C_in, HW), lambda n: (n, 0, 0)),
                pl.BlockSpec((1, C_skip, HWp), lambda n: (n, 0, 0)),
                pl.BlockSpec((3, 3, C_out, C_in), lambda n: (0, 0, 0, 0)),
                pl.BlockSpec((3, 3, C_mid, C_out), lambda n: (0, 0, 0, 0)),
                pl.BlockSpec((3, 3, C_mid, C_skip), lambda n: (0, 0, 0, 0)),
                pl.BlockSpec((3, 3, C_out, C_mid), lambda n: (0, 0, 0, 0)),
                pl.BlockSpec((C_out, 1), lambda n: (0, 0)),
                pl.BlockSpec((C_mid, 1), lambda n: (0, 0)),
                pl.BlockSpec((C_out, 1), lambda n: (0, 0)),
                pl.BlockSpec((W, Wp), lambda n: (0, 0)),
                pl.BlockSpec((W, Wp), lambda n: (0, 0)),
                pl.BlockSpec((1, HW), lambda n: (0, 0)),
                pl.BlockSpec((1, HWp), lambda n: (0, 0)),
                pl.BlockSpec((1, HWp), lambda n: (0, 0)),
            ],
            out_specs=pl.BlockSpec((1, C_out, HWp), lambda n: (n, 0, 0)),
            scratch_shapes=[
                pltpu.VMEM((C_in, Lx), compute_dtype),
                pltpu.VMEM((C_out, Lb), compute_dtype),
                pltpu.VMEM((C_skip, Lb), compute_dtype),
                pltpu.VMEM((C_mid, Lb), compute_dtype),
            ],
        ),
        compiler_params=pltpu.CompilerParams(
            dimension_semantics=("parallel",),
            vmem_limit_bytes=vmem_limit),
    )(x2d, skip2d, wd, w1u, w1s, w2, b0_, b1_, b2_, se, so, mx, ml, mr)

    # channel-major kernel output is already NCHW: just a free reshape.
    return out2d.reshape(N, C_out, Hp, Wp)


@functools.partial(jax.jit, static_argnames=("compute_dtype",))
def decoder_forward(x_nchw, skip_nchw, params, *, compute_dtype=jnp.bfloat16):
    """Matches Decoder.forward: NCHW in / NCHW out (output in compute_dtype)."""
    return _decoder_pallas(x_nchw, skip_nchw, params, compute_dtype)


# ---------------------------------------------------------------------------
# Pure-JAX reference (lax convs) for correctness checking
# ---------------------------------------------------------------------------
def _reference_decoder(x_nchw, skip_nchw, params):
    def leaky(v):
        return jnp.where(v > 0, v, 0.2 * v)

    x = jnp.transpose(x_nchw, (0, 2, 3, 1))
    skip = jnp.transpose(skip_nchw, (0, 2, 3, 1))

    # ConvTranspose2d(k=3, s=2, p=1, output_padding=1) == lhs-dilated conv with
    # the spatially-flipped kernel and padding (k-1-p, k-1-p+op) = (1, 2).
    w_t = params["w_deconv"]
    w_flip = jnp.transpose(w_t[:, :, ::-1, ::-1], (2, 3, 0, 1))   # HWIO
    up = jax.lax.conv_general_dilated(
        x, w_flip, window_strides=(1, 1), padding=((1, 2), (1, 2)),
        lhs_dilation=(2, 2), dimension_numbers=("NHWC", "HWIO", "NHWC"))
    s0, b0 = _fold_bn(params["bn0_gamma"], params["bn0_beta"],
                      params["bn0_mean"], params["bn0_var"])
    up = leaky(up * s0 + b0)

    y = jnp.concatenate([up, skip], axis=-1)

    def conv3x3(v, w_oihw):
        w = jnp.transpose(w_oihw, (2, 3, 1, 0))
        return jax.lax.conv_general_dilated(
            v, w, window_strides=(1, 1), padding="SAME",
            dimension_numbers=("NHWC", "HWIO", "NHWC"))

    s1, b1 = _fold_bn(params["bn1_gamma"], params["bn1_beta"],
                      params["bn1_mean"], params["bn1_var"])
    s2, b2 = _fold_bn(params["bn2_gamma"], params["bn2_beta"],
                      params["bn2_mean"], params["bn2_var"])
    y = leaky(conv3x3(y, params["w1"]) * s1 + b1)
    y = leaky(conv3x3(y, params["w2"]) * s2 + b2)
    return jnp.transpose(y, (0, 3, 1, 2))


if __name__ == "__main__":
    key = jax.random.PRNGKey(0)
    N = 2
    in_channels, out_channels = 16, 8       # Decoder(in_channels, out_channels)
    c_skip = in_channels - out_channels     # cat([up, skip]) must have in_channels
    H = W = 8                               # decoder input spatial; output is 16x16

    ks = jax.random.split(key, 8)
    x_nchw = jax.random.normal(ks[0], (N, in_channels, H, W), jnp.float32)
    skip_nchw = jax.random.normal(ks[1], (N, c_skip, 2 * H, 2 * W), jnp.float32)

    def bn_params(k, c):
        k1, k2, k3, k4 = jax.random.split(k, 4)
        return (1.0 + 0.1 * jax.random.normal(k1, (c,), jnp.float32),
                0.1 * jax.random.normal(k2, (c,), jnp.float32),
                0.05 * jax.random.normal(k3, (c,), jnp.float32),
                jnp.abs(1.0 + 0.1 * jax.random.normal(k4, (c,), jnp.float32)))

    g0, be0, m0, v0 = bn_params(ks[5], out_channels)
    g1, be1, m1, v1 = bn_params(ks[6], out_channels)
    g2, be2, m2, v2 = bn_params(ks[7], out_channels)

    params = {
        # PyTorch layouts: ConvTranspose2d weight (C_in, C_out, 3, 3); Conv2d OIHW.
        "w_deconv": 0.1 * jax.random.normal(
            ks[2], (in_channels, out_channels, 3, 3), jnp.float32),
        "w1": 0.1 * jax.random.normal(
            ks[3], (out_channels, in_channels, 3, 3), jnp.float32),
        "w2": 0.1 * jax.random.normal(
            ks[4], (out_channels, out_channels, 3, 3), jnp.float32),
        "bn0_gamma": g0, "bn0_beta": be0, "bn0_mean": m0, "bn0_var": v0,
        "bn1_gamma": g1, "bn1_beta": be1, "bn1_mean": m1, "bn1_var": v1,
        "bn2_gamma": g2, "bn2_beta": be2, "bn2_mean": m2, "bn2_var": v2,
    }

    ref = _reference_decoder(x_nchw, skip_nchw, params)

    # f32 compute path: tight numerical check against the pure-JAX reference.
    out_f32 = jax.block_until_ready(
        decoder_forward(x_nchw, skip_nchw, params, compute_dtype=jnp.float32))
    assert out_f32.shape == (N, out_channels, 2 * H, 2 * W), out_f32.shape
    err32 = float(jnp.max(jnp.abs(out_f32 - ref)))
    assert jnp.allclose(out_f32, ref, atol=5e-3, rtol=5e-3), err32

    # bf16 path (default): bf16 operands/activations/output, f32 accumulation.
    out_bf16 = jax.block_until_ready(
        decoder_forward(x_nchw, skip_nchw, params, compute_dtype=jnp.bfloat16))
    errbf = float(jnp.max(jnp.abs(out_bf16.astype(jnp.float32) - ref)))
    assert jnp.allclose(out_bf16.astype(jnp.float32), ref,
                        atol=1e-1, rtol=5e-2), errbf

    print("KERNEL_OK")
</pallas_src>

<mosaic_0001>
module attributes {stable_mosaic.version = 11 : i64} {
  func.func @_decoder_fused_kernel(%arg0: i32, %arg1: memref<1x16x64xf32, #tpu.memory_space<vmem>>, %arg2: memref<1x8x256xf32, #tpu.memory_space<vmem>>, %arg3: memref<3x3x8x16xf32, #tpu.memory_space<vmem>>, %arg4: memref<3x3x8x8xf32, #tpu.memory_space<vmem>>, %arg5: memref<3x3x8x8xf32, #tpu.memory_space<vmem>>, %arg6: memref<3x3x8x8xf32, #tpu.memory_space<vmem>>, %arg7: memref<8x1xf32, #tpu.memory_space<vmem>>, %arg8: memref<8x1xf32, #tpu.memory_space<vmem>>, %arg9: memref<8x1xf32, #tpu.memory_space<vmem>>, %arg10: memref<8x16xf32, #tpu.memory_space<vmem>>, %arg11: memref<8x16xf32, #tpu.memory_space<vmem>>, %arg12: memref<1x64xf32, #tpu.memory_space<vmem>>, %arg13: memref<1x256xf32, #tpu.memory_space<vmem>>, %arg14: memref<1x256xf32, #tpu.memory_space<vmem>>, %arg15: memref<1x8x256xf32, #tpu.memory_space<vmem>>, %arg16: memref<16x128xf32, #tpu.memory_space<vmem>>, %arg17: memref<8x384xf32, #tpu.memory_space<vmem>>, %arg18: memref<8x384xf32, #tpu.memory_space<vmem>>, %arg19: memref<8x384xf32, #tpu.memory_space<vmem>>) attributes {dimension_semantics = [#tpu.dimension_semantics<parallel>], iteration_bounds = array<i64: 2>, scalar_prefetch = 0 : i64, scratch_operands = 4 : i64, tpu.core_type = #tpu.core_type<tc>, window_params = [{transform_indices = @transform_0, window_bounds = array<i64: 1, 16, 64>}, {transform_indices = @transform_1, window_bounds = array<i64: 1, 8, 256>}, {pipeline_mode = #tpu.pipeline_mode<synchronous>, transform_indices = @transform_2, window_bounds = array<i64: 3, 3, 8, 16>}, {pipeline_mode = #tpu.pipeline_mode<synchronous>, transform_indices = @transform_3, window_bounds = array<i64: 3, 3, 8, 8>}, {pipeline_mode = #tpu.pipeline_mode<synchronous>, transform_indices = @transform_4, window_bounds = array<i64: 3, 3, 8, 8>}, {pipeline_mode = #tpu.pipeline_mode<synchronous>, transform_indices = @transform_5, window_bounds = array<i64: 3, 3, 8, 8>}, {pipeline_mode = #tpu.pipeline_mode<synchronous>, transform_indices = @transform_6, window_bounds = array<i64: 8, 1>}, {pipeline_mode = #tpu.pipeline_mode<synchronous>, transform_indices = @transform_7, window_bounds = array<i64: 8, 1>}, {pipeline_mode = #tpu.pipeline_mode<synchronous>, transform_indices = @transform_8, window_bounds = array<i64: 8, 1>}, {pipeline_mode = #tpu.pipeline_mode<synchronous>, transform_indices = @transform_9, window_bounds = array<i64: 8, 16>}, {pipeline_mode = #tpu.pipeline_mode<synchronous>, transform_indices = @transform_10, window_bounds = array<i64: 8, 16>}, {pipeline_mode = #tpu.pipeline_mode<synchronous>, transform_indices = @transform_11, window_bounds = array<i64: 1, 64>}, {pipeline_mode = #tpu.pipeline_mode<synchronous>, transform_indices = @transform_12, window_bounds = array<i64: 1, 256>}, {pipeline_mode = #tpu.pipeline_mode<synchronous>, transform_indices = @transform_13, window_bounds = array<i64: 1, 256>}, {transform_indices = @transform_14, window_bounds = array<i64: 1, 8, 256>}]} {
    %cst = arith.constant 0.000000e+00 : f32
    %0 = vector.broadcast %cst : f32 to vector<16x64xf32>
    %c0 = arith.constant 0 : index
    %c64 = arith.constant 64 : index
    %1 = vector.load %arg16[%c0, %c64] : memref<16x128xf32, #tpu.memory_space<vmem>>, vector<16x64xf32>
    tpu.vector_store %arg16[%c0, %c64], %0 {strides = array<i32>} : memref<16x128xf32, #tpu.memory_space<vmem>>, vector<16x64xf32>,
    %cst_0 = arith.constant 0.000000e+00 : f32
    %2 = vector.broadcast %cst_0 : f32 to vector<8x17xf32>
    %c0_1 = arith.constant 0 : index
    %c0_2 = arith.constant 0 : index
    %3 = vector.load %arg17[%c0_1, %c0_2] : memref<8x384xf32, #tpu.memory_space<vmem>>, vector<8x17xf32>
    tpu.vector_store %arg17[%c0_1, %c0_2], %2 {strides = array<i32>} : memref<8x384xf32, #tpu.memory_space<vmem>>, vector<8x17xf32>,
    %cst_3 = arith.constant 0.000000e+00 : f32
    %4 = vector.broadcast %cst_3 : f32 to vector<8x111xf32>
    %c0_4 = arith.constant 0 : index
    %c273 = arith.constant 273 : index
    %5 = vector.load %arg17[%c0_4, %c273] : memref<8x384xf32, #tpu.memory_space<vmem>>, vector<8x111xf32>
    tpu.vector_store %arg17[%c0_4, %c273], %4 {strides = array<i32>} : memref<8x384xf32, #tpu.memory_space<vmem>>, vector<8x111xf32>,
    %cst_5 = arith.constant 0.000000e+00 : f32
    %6 = vector.broadcast %cst_5 : f32 to vector<8x17xf32>
    %c0_6 = arith.constant 0 : index
    %c0_7 = arith.constant 0 : index
    %7 = vector.load %arg18[%c0_6, %c0_7] : memref<8x384xf32, #tpu.memory_space<vmem>>, vector<8x17xf32>
    tpu.vector_store %arg18[%c0_6, %c0_7], %6 {strides = array<i32>} : memref<8x384xf32, #tpu.memory_space<vmem>>, vector<8x17xf32>,
    %cst_8 = arith.constant 0.000000e+00 : f32
    %8 = vector.broadcast %cst_8 : f32 to vector<8x111xf32>
    %c0_9 = arith.constant 0 : index
    %c273_10 = arith.constant 273 : index
    %9 = vector.load %arg18[%c0_9, %c273_10] : memref<8x384xf32, #tpu.memory_space<vmem>>, vector<8x111xf32>
    tpu.vector_store %arg18[%c0_9, %c273_10], %8 {strides = array<i32>} : memref<8x384xf32, #tpu.memory_space<vmem>>, vector<8x111xf32>,
    %cst_11 = arith.constant 0.000000e+00 : f32
    %10 = vector.broadcast %cst_11 : f32 to vector<8x17xf32>
    %c0_12 = arith.constant 0 : index
    %c0_13 = arith.constant 0 : index
    %11 = vector.load %arg19[%c0_12, %c0_13] : memref<8x384xf32, #tpu.memory_space<vmem>>, vector<8x17xf32>
    tpu.vector_store %arg19[%c0_12, %c0_13], %10 {strides = array<i32>} : memref<8x384xf32, #tpu.memory_space<vmem>>, vector<8x17xf32>,
    %cst_14 = arith.constant 0.000000e+00 : f32
    %12 = vector.broadcast %cst_14 : f32 to vector<8x111xf32>
    %c0_15 = arith.constant 0 : index
    %c273_16 = arith.constant 273 : index
    %13 = vector.load %arg19[%c0_15, %c273_16] : memref<8x384xf32, #tpu.memory_space<vmem>>, vector<8x111xf32>
    tpu.vector_store %arg19[%c0_15, %c273_16], %12 {strides = array<i32>} : memref<8x384xf32, #tpu.memory_space<vmem>>, vector<8x111xf32>,
    %c0_17 = arith.constant 0 : index
    %c0_18 = arith.constant 0 : index
    %c0_19 = arith.constant 0 : index
    %14 = vector.load %arg1[%c0_17, %c0_18, %c0_19] : memref<1x16x64xf32, #tpu.memory_space<vmem>>, vector<1x16x64xf32>
    %15 = vector.shape_cast %14 : vector<1x16x64xf32> to vector<16x64xf32>
    %c0_20 = arith.constant 0 : index
    %c0_21 = arith.constant 0 : index
    %16 = vector.load %arg16[%c0_20, %c0_21] : memref<16x128xf32, #tpu.memory_space<vmem>>, vector<16x64xf32>
    tpu.vector_store %arg16[%c0_20, %c0_21], %15 {strides = array<i32>} : memref<16x128xf32, #tpu.memory_space<vmem>>, vector<16x64xf32>,
    %c0_22 = arith.constant 0 : index
    %c0_23 = arith.constant 0 : index
    %17 = vector.load %arg16[%c0_22, %c0_23] : memref<16x128xf32, #tpu.memory_space<vmem>>, vector<16x64xf32>
    %c0_24 = arith.constant 0 : index
    %c1 = arith.constant 1 : index
    %18 = vector.load %arg16[%c0_24, %c1] : memref<16x128xf32, #tpu.memory_space<vmem>>, vector<16x64xf32>
    %c0_25 = arith.constant 0 : index
    %c8 = arith.constant 8 : index
    %19 = vector.load %arg16[%c0_25, %c8] : memref<16x128xf32, #tpu.memory_space<vmem>>, vector<16x64xf32>
    %c0_26 = arith.constant 0 : index
    %c9 = arith.constant 9 : index
    %20 = vector.load %arg16[%c0_26, %c9] : memref<16x128xf32, #tpu.memory_space<vmem>>, vector<16x64xf32>
    %c0_27 = arith.constant 0 : index
    %c0_28 = arith.constant 0 : index
    %21 = vector.load %arg12[%c0_27, %c0_28] : memref<1x64xf32, #tpu.memory_space<vmem>>, vector<1x64xf32>
    %c0_29 = arith.constant 0 : index
    %c0_30 = arith.constant 0 : index
    %22 = vector.load %arg7[%c0_29, %c0_30] : memref<8x1xf32, #tpu.memory_space<vmem>>, vector<8x1xf32>
    %c1_31 = arith.constant 1 : index
    %c1_32 = arith.constant 1 : index
    %c0_33 = arith.constant 0 : index
    %c0_34 = arith.constant 0 : index
    %23 = vector.load %arg3[%c1_31, %c1_32, %c0_33, %c0_34] : memref<3x3x8x16xf32, #tpu.memory_space<vmem>>, vector<1x1x8x16xf32>
    %24 = vector.shape_cast %23 : vector<1x1x8x16xf32> to vector<8x16xf32>
    %cst_35 = arith.constant dense<0.000000e+00> : vector<8x64xf32>
    %25 = tpu.matmul %24, %17, %cst_35 {dimension_numbers = #tpu.dot_dimension_numbers<[1], [0], [0], [1], [0, 0, 1, 1], [], []>} : vector<8x16xf32>, vector<16x64xf32>, vector<8x64xf32> -> vector<8x64xf32>
    %c1_36 = arith.constant 1 : index
    %c2 = arith.constant 2 : index
    %c0_37 = arith.constant 0 : index
    %c0_38 = arith.constant 0 : index
    %26 = vector.load %arg3[%c1_36, %c2, %c0_37, %c0_38] : memref<3x3x8x16xf32, #tpu.memory_space<vmem>>, vector<1x1x8x16xf32>
    %27 = vector.shape_cast %26 : vector<1x1x8x16xf32> to vector<8x16xf32>
    %cst_39 = arith.constant dense<0.000000e+00> : vector<8x64xf32>
    %28 = tpu.matmul %27, %17, %cst_39 {dimension_numbers = #tpu.dot_dimension_numbers<[1], [0], [0], [1], [0, 0, 1, 1], [], []>} : vector<8x16xf32>, vector<16x64xf32>, vector<8x64xf32> -> vector<8x64xf32>
    %c1_40 = arith.constant 1 : index
    %c0_41 = arith.constant 0 : index
    %c0_42 = arith.constant 0 : index
    %c0_43 = arith.constant 0 : index
    %29 = vector.load %arg3[%c1_40, %c0_41, %c0_42, %c0_43] : memref<3x3x8x16xf32, #tpu.memory_space<vmem>>, vector<1x1x8x16xf32>
    %30 = vector.shape_cast %29 : vector<1x1x8x16xf32> to vector<8x16xf32>
    %cst_44 = arith.constant dense<0.000000e+00> : vector<8x64xf32>
    %31 = tpu.matmul %30, %18, %cst_44 {dimension_numbers = #tpu.dot_dimension_numbers<[1], [0], [0], [1], [0, 0, 1, 1], [], []>} : vector<8x16xf32>, vector<16x64xf32>, vector<8x64xf32> -> vector<8x64xf32>
    %32 = vector.broadcast %21 : vector<1x64xf32> to vector<8x64xf32>
    %33 = arith.mulf %32, %31 : vector<8x64xf32>
    %34 = arith.addf %28, %33 : vector<8x64xf32>
    %c2_45 = arith.constant 2 : index
    %c1_46 = arith.constant 1 : index
    %c0_47 = arith.constant 0 : index
    %c0_48 = arith.constant 0 : index
    %35 = vector.load %arg3[%c2_45, %c1_46, %c0_47, %c0_48] : memref<3x3x8x16xf32, #tpu.memory_space<vmem>>, vector<1x1x8x16xf32>
    %36 = vector.shape_cast %35 : vector<1x1x8x16xf32> to vector<8x16xf32>
    %cst_49 = arith.constant dense<0.000000e+00> : vector<8x64xf32>
    %37 = tpu.matmul %36, %17, %cst_49 {dimension_numbers = #tpu.dot_dimension_numbers<[1], [0], [0], [1], [0, 0, 1, 1], [], []>} : vector<8x16xf32>, vector<16x64xf32>, vector<8x64xf32> -> vector<8x64xf32>
    %c0_50 = arith.constant 0 : index
    %c1_51 = arith.constant 1 : index
    %c0_52 = arith.constant 0 : index
    %c0_53 = arith.constant 0 : index
    %38 = vector.load %arg3[%c0_50, %c1_51, %c0_52, %c0_53] : memref<3x3x8x16xf32, #tpu.memory_space<vmem>>, vector<1x1x8x16xf32>
    %39 = vector.shape_cast %38 : vector<1x1x8x16xf32> to vector<8x16xf32>
    %cst_54 = arith.constant dense<0.000000e+00> : vector<8x64xf32>
    %40 = tpu.matmul %39, %19, %cst_54 {dimension_numbers = #tpu.dot_dimension_numbers<[1], [0], [0], [1], [0, 0, 1, 1], [], []>} : vector<8x16xf32>, vector<16x64xf32>, vector<8x64xf32> -> vector<8x64xf32>
    %41 = arith.addf %37, %40 : vector<8x64xf32>
    %c2_55 = arith.constant 2 : index
    %c2_56 = arith.constant 2 : index
    %c0_57 = arith.constant 0 : index
    %c0_58 = arith.constant 0 : index
    %42 = vector.load %arg3[%c2_55, %c2_56, %c0_57, %c0_58] : memref<3x3x8x16xf32, #tpu.memory_space<vmem>>, vector<1x1x8x16xf32>
    %43 = vector.shape_cast %42 : vector<1x1x8x16xf32> to vector<8x16xf32>
    %cst_59 = arith.constant dense<0.000000e+00> : vector<8x64xf32>
    %44 = tpu.matmul %43, %17, %cst_59 {dimension_numbers = #tpu.dot_dimension_numbers<[1], [0], [0], [1], [0, 0, 1, 1], [], []>} : vector<8x16xf32>, vector<16x64xf32>, vector<8x64xf32> -> vector<8x64xf32>
    %c0_60 = arith.constant 0 : index
    %c2_61 = arith.constant 2 : index
    %c0_62 = arith.constant 0 : index
    %c0_63 = arith.constant 0 : index
    %45 = vector.load %arg3[%c0_60, %c2_61, %c0_62, %c0_63] : memref<3x3x8x16xf32, #tpu.memory_space<vmem>>, vector<1x1x8x16xf32>
    %46 = vector.shape_cast %45 : vector<1x1x8x16xf32> to vector<8x16xf32>
    %cst_64 = arith.constant dense<0.000000e+00> : vector<8x64xf32>
    %47 = tpu.matmul %46, %19, %cst_64 {dimension_numbers = #tpu.dot_dimension_numbers<[1], [0], [0], [1], [0, 0, 1, 1], [], []>} : vector<8x16xf32>, vector<16x64xf32>, vector<8x64xf32> -> vector<8x64xf32>
    %48 = arith.addf %44, %47 : vector<8x64xf32>
    %c2_65 = arith.constant 2 : index
    %c0_66 = arith.constant 0 : index
    %c0_67 = arith.constant 0 : index
    %c0_68 = arith.constant 0 : index
    %49 = vector.load %arg3[%c2_65, %c0_66, %c0_67, %c0_68] : memref<3x3x8x16xf32, #tpu.memory_space<vmem>>, vector<1x1x8x16xf32>
    %50 = vector.shape_cast %49 : vector<1x1x8x16xf32> to vector<8x16xf32>
    %cst_69 = arith.constant dense<0.000000e+00> : vector<8x64xf32>
    %51 = tpu.matmul %50, %18, %cst_69 {dimension_numbers = #tpu.dot_dimension_numbers<[1], [0], [0], [1], [0, 0, 1, 1], [], []>} : vector<8x16xf32>, vector<16x64xf32>, vector<8x64xf32> -> vector<8x64xf32>
    %c0_70 = arith.constant 0 : index
    %c0_71 = arith.constant 0 : index
    %c0_72 = arith.constant 0 : index
    %c0_73 = arith.constant 0 : index
    %52 = vector.load %arg3[%c0_70, %c0_71, %c0_72, %c0_73] : memref<3x3x8x16xf32, #tpu.memory_space<vmem>>, vector<1x1x8x16xf32>
    %53 = vector.shape_cast %52 : vector<1x1x8x16xf32> to vector<8x16xf32>
    %cst_74 = arith.constant dense<0.000000e+00> : vector<8x64xf32>
    %54 = tpu.matmul %53, %20, %cst_74 {dimension_numbers = #tpu.dot_dimension_numbers<[1], [0], [0], [1], [0, 0, 1, 1], [], []>} : vector<8x16xf32>, vector<16x64xf32>, vector<8x64xf32> -> vector<8x64xf32>
    %55 = arith.addf %51, %54 : vector<8x64xf32>
    %56 = vector.broadcast %21 : vector<1x64xf32> to vector<8x64xf32>
    %57 = arith.mulf %56, %55 : vector<8x64xf32>
    %58 = arith.addf %48, %57 : vector<8x64xf32>
    %59 = vector.broadcast %22 : vector<8x1xf32> to vector<8x64xf32>
    %60 = arith.addf %25, %59 : vector<8x64xf32>
    %cst_75 = arith.constant 0.000000e+00 : f32
    %61 = vector.broadcast %cst_75 : f32 to vector<8x64xf32>
    %62 = arith.cmpf ogt, %60, %61 : vector<8x64xf32>
    %cst_76 = arith.constant 2.000000e-01 : f32
    %63 = vector.broadcast %cst_76 : f32 to vector<8x64xf32>
    %64 = arith.mulf %63, %60 : vector<8x64xf32>
    %65 = arith.select %62, %60, %64 : vector<8x64xi1>, vector<8x64xf32>
    %66 = vector.broadcast %22 : vector<8x1xf32> to vector<8x64xf32>
    %67 = arith.addf %34, %66 : vector<8x64xf32>
    %cst_77 = arith.constant 0.000000e+00 : f32
    %68 = vector.broadcast %cst_77 : f32 to vector<8x64xf32>
    %69 = arith.cmpf ogt, %67, %68 : vector<8x64xf32>
    %cst_78 = arith.constant 2.000000e-01 : f32
    %70 = vector.broadcast %cst_78 : f32 to vector<8x64xf32>
    %71 = arith.mulf %70, %67 : vector<8x64xf32>
    %72 = arith.select %69, %67, %71 : vector<8x64xi1>, vector<8x64xf32>
    %73 = vector.broadcast %22 : vector<8x1xf32> to vector<8x64xf32>
    %74 = arith.addf %41, %73 : vector<8x64xf32>
    %cst_79 = arith.constant 0.000000e+00 : f32
    %75 = vector.broadcast %cst_79 : f32 to vector<8x64xf32>
    %76 = arith.cmpf ogt, %74, %75 : vector<8x64xf32>
    %cst_80 = arith.constant 2.000000e-01 : f32
    %77 = vector.broadcast %cst_80 : f32 to vector<8x64xf32>
    %78 = arith.mulf %77, %74 : vector<8x64xf32>
    %79 = arith.select %76, %74, %78 : vector<8x64xi1>, vector<8x64xf32>
    %80 = vector.broadcast %22 : vector<8x1xf32> to vector<8x64xf32>
    %81 = arith.addf %58, %80 : vector<8x64xf32>
    %cst_81 = arith.constant 0.000000e+00 : f32
    %82 = vector.broadcast %cst_81 : f32 to vector<8x64xf32>
    %83 = arith.cmpf ogt, %81, %82 : vector<8x64xf32>
    %cst_82 = arith.constant 2.000000e-01 : f32
    %84 = vector.broadcast %cst_82 : f32 to vector<8x64xf32>
    %85 = arith.mulf %84, %81 : vector<8x64xf32>
    %86 = arith.select %83, %81, %85 : vector<8x64xi1>, vector<8x64xf32>
    %c0_83 = arith.constant 0 : index
    %c0_84 = arith.constant 0 : index
    %87 = vector.load %arg10[%c0_83, %c0_84] : memref<8x16xf32, #tpu.memory_space<vmem>>, vector<8x16xf32>
    %c0_85 = arith.constant 0 : index
    %c0_86 = arith.constant 0 : index
    %88 = vector.load %arg11[%c0_85, %c0_86] : memref<8x16xf32, #tpu.memory_space<vmem>>, vector<8x16xf32>
    %89 = vector.extract_strided_slice %65 {offsets = [0, 0], sizes = [8, 8], strides = [1, 1]} : vector<8x64xf32> to vector<8x8xf32>
    %cst_87 = arith.constant dense<0.000000e+00> : vector<8x16xf32>
    %90 = tpu.matmul %89, %87, %cst_87 {dimension_numbers = #tpu.dot_dimension_numbers<[1], [0], [0], [1], [0, 0, 1, 1], [], []>} : vector<8x8xf32>, vector<8x16xf32>, vector<8x16xf32> -> vector<8x16xf32>
    %91 = vector.extract_strided_slice %72 {offsets = [0, 0], sizes = [8, 8], strides = [1, 1]} : vector<8x64xf32> to vector<8x8xf32>
    %cst_88 = arith.constant dense<0.000000e+00> : vector<8x16xf32>
    %92 = tpu.matmul %91, %88, %cst_88 {dimension_numbers = #tpu.dot_dimension_numbers<[1], [0], [0], [1], [0, 0, 1, 1], [], []>} : vector<8x8xf32>, vector<8x16xf32>, vector<8x16xf32> -> vector<8x16xf32>
    %93 = arith.addf %90, %92 : vector<8x16xf32>
    %94 = vector.extract_strided_slice %79 {offsets = [0, 0], sizes = [8, 8], strides = [1, 1]} : vector<8x64xf32> to vector<8x8xf32>
    %cst_89 = arith.constant dense<0.000000e+00> : vector<8x16xf32>
    %95 = tpu.matmul %94, %87, %cst_89 {dimension_numbers = #tpu.dot_dimension_numbers<[1], [0], [0], [1], [0, 0, 1, 1], [], []>} : vector<8x8xf32>, vector<8x16xf32>, vector<8x16xf32> -> vector<8x16xf32>
    %96 = vector.extract_strided_slice %86 {offsets = [0, 0], sizes = [8, 8], strides = [1, 1]} : vector<8x64xf32> to vector<8x8xf32>
    %cst_90 = arith.constant dense<0.000000e+00> : vector<8x16xf32>
    %97 = tpu.matmul %96, %88, %cst_90 {dimension_numbers = #tpu.dot_dimension_numbers<[1], [0], [0], [1], [0, 0, 1, 1], [], []>} : vector<8x8xf32>, vector<8x16xf32>, vector<8x16xf32> -> vector<8x16xf32>
    %98 = arith.addf %95, %97 : vector<8x16xf32>
    %c0_91 = arith.constant 0 : index
    %c17 = arith.constant 17 : index
    %99 = vector.load %arg17[%c0_91, %c17] : memref<8x384xf32, #tpu.memory_space<vmem>>, vector<8x16xf32>
    tpu.vector_store %arg17[%c0_91, %c17], %93 {strides = array<i32>} : memref<8x384xf32, #tpu.memory_space<vmem>>, vector<8x16xf32>,
    %c0_92 = arith.constant 0 : index
    %c33 = arith.constant 33 : index
    %100 = vector.load %arg17[%c0_92, %c33] : memref<8x384xf32, #tpu.memory_space<vmem>>, vector<8x16xf32>
    tpu.vector_store %arg17[%c0_92, %c33], %98 {strides = array<i32>} : memref<8x384xf32, #tpu.memory_space<vmem>>, vector<8x16xf32>,
    %101 = vector.extract_strided_slice %65 {offsets = [0, 8], sizes = [8, 8], strides = [1, 1]} : vector<8x64xf32> to vector<8x8xf32>
    %cst_93 = arith.constant dense<0.000000e+00> : vector<8x16xf32>
    %102 = tpu.matmul %101, %87, %cst_93 {dimension_numbers = #tpu.dot_dimension_numbers<[1], [0], [0], [1], [0, 0, 1, 1], [], []>} : vector<8x8xf32>, vector<8x16xf32>, vector<8x16xf32> -> vector<8x16xf32>
    %103 = vector.extract_strided_slice %72 {offsets = [0, 8], sizes = [8, 8], strides = [1, 1]} : vector<8x64xf32> to vector<8x8xf32>
    %cst_94 = arith.constant dense<0.000000e+00> : vector<8x16xf32>
    %104 = tpu.matmul %103, %88, %cst_94 {dimension_numbers = #tpu.dot_dimension_numbers<[1], [0], [0], [1], [0, 0, 1, 1], [], []>} : vector<8x8xf32>, vector<8x16xf32>, vector<8x16xf32> -> vector<8x16xf32>
    %105 = arith.addf %102, %104 : vector<8x16xf32>
    %106 = vector.extract_strided_slice %79 {offsets = [0, 8], sizes = [8, 8], strides = [1, 1]} : vector<8x64xf32> to vector<8x8xf32>
    %cst_95 = arith.constant dense<0.000000e+00> : vector<8x16xf32>
    %107 = tpu.matmul %106, %87, %cst_95 {dimension_numbers = #tpu.dot_dimension_numbers<[1], [0], [0], [1], [0, 0, 1, 1], [], []>} : vector<8x8xf32>, vector<8x16xf32>, vector<8x16xf32> -> vector<8x16xf32>
    %108 = vector.extract_strided_slice %86 {offsets = [0, 8], sizes = [8, 8], strides = [1, 1]} : vector<8x64xf32> to vector<8x8xf32>
    %cst_96 = arith.constant dense<0.000000e+00> : vector<8x16xf32>
    %109 = tpu.matmul %108, %88, %cst_96 {dimension_numbers = #tpu.dot_dimension_numbers<[1], [0], [0], [1], [0, 0, 1, 1], [], []>} : vector<8x8xf32>, vector<8x16xf32>, vector<8x16xf32> -> vector<8x16xf32>
    %110 = arith.addf %107, %109 : vector<8x16xf32>
    %c0_97 = arith.constant 0 : index
    %c49 = arith.constant 49 : index
    %111 = vector.load %arg17[%c0_97, %c49] : memref<8x384xf32, #tpu.memory_space<vmem>>, vector<8x16xf32>
    tpu.vector_store %arg17[%c0_97, %c49], %105 {strides = array<i32>} : memref<8x384xf32, #tpu.memory_space<vmem>>, vector<8x16xf32>,
    %c0_98 = arith.constant 0 : index
    %c65 = arith.constant 65 : index
    %112 = vector.load %arg17[%c0_98, %c65] : memref<8x384xf32, #tpu.memory_space<vmem>>, vector<8x16xf32>
    tpu.vector_store %arg17[%c0_98, %c65], %110 {strides = array<i32>} : memref<8x384xf32, #tpu.memory_space<vmem>>, vector<8x16xf32>,
    %113 = vector.extract_strided_slice %65 {offsets = [0, 16], sizes = [8, 8], strides = [1, 1]} : vector<8x64xf32> to vector<8x8xf32>
    %cst_99 = arith.constant dense<0.000000e+00> : vector<8x16xf32>
    %114 = tpu.matmul %113, %87, %cst_99 {dimension_numbers = #tpu.dot_dimension_numbers<[1], [0], [0], [1], [0, 0, 1, 1], [], []>} : vector<8x8xf32>, vector<8x16xf32>, vector<8x16xf32> -> vector<8x16xf32>
    %115 = vector.extract_strided_slice %72 {offsets = [0, 16], sizes = [8, 8], strides = [1, 1]} : vector<8x64xf32> to vector<8x8xf32>
    %cst_100 = arith.constant dense<0.000000e+00> : vector<8x16xf32>
    %116 = tpu.matmul %115, %88, %cst_100 {dimension_numbers = #tpu.dot_dimension_numbers<[1], [0], [0], [1], [0, 0, 1, 1], [], []>} : vector<8x8xf32>, vector<8x16xf32>, vector<8x16xf32> -> vector<8x16xf32>
    %117 = arith.addf %114, %116 : vector<8x16xf32>
    %118 = vector.extract_strided_slice %79 {offsets = [0, 16], sizes = [8, 8], strides = [1, 1]} : vector<8x64xf32> to vector<8x8xf32>
    %cst_101 = arith.constant dense<0.000000e+00> : vector<8x16xf32>
    %119 = tpu.matmul %118, %87, %cst_101 {dimension_numbers = #tpu.dot_dimension_numbers<[1], [0], [0], [1], [0, 0, 1, 1], [], []>} : vector<8x8xf32>, vector<8x16xf32>, vector<8x16xf32> -> vector<8x16xf32>
    %120 = vector.extract_strided_slice %86 {offsets = [0, 16], sizes = [8, 8], strides = [1, 1]} : vector<8x64xf32> to vector<8x8xf32>
    %cst_102 = arith.constant dense<0.000000e+00> : vector<8x16xf32>
    %121 = tpu.matmul %120, %88, %cst_102 {dimension_numbers = #tpu.dot_dimension_numbers<[1], [0], [0], [1], [0, 0, 1, 1], [], []>} : vector<8x8xf32>, vector<8x16xf32>, vector<8x16xf32> -> vector<8x16xf32>
    %122 = arith.addf %119, %121 : vector<8x16xf32>
    %c0_103 = arith.constant 0 : index
    %c81 = arith.constant 81 : index
    %123 = vector.load %arg17[%c0_103, %c81] : memref<8x384xf32, #tpu.memory_space<vmem>>, vector<8x16xf32>
    tpu.vector_store %arg17[%c0_103, %c81], %117 {strides = array<i32>} : memref<8x384xf32, #tpu.memory_space<vmem>>, vector<8x16xf32>,
    %c0_104 = arith.constant 0 : index
    %c97 = arith.constant 97 : index
    %124 = vector.load %arg17[%c0_104, %c97] : memref<8x384xf32, #tpu.memory_space<vmem>>, vector<8x16xf32>
    tpu.vector_store %arg17[%c0_104, %c97], %122 {strides = array<i32>} : memref<8x384xf32, #tpu.memory_space<vmem>>, vector<8x16xf32>,
    %125 = vector.extract_strided_slice %65 {offsets = [0, 24], sizes = [8, 8], strides = [1, 1]} : vector<8x64xf32> to vector<8x8xf32>
    %cst_105 = arith.constant dense<0.000000e+00> : vector<8x16xf32>
    %126 = tpu.matmul %125, %87, %cst_105 {dimension_numbers = #tpu.dot_dimension_numbers<[1], [0], [0], [1], [0, 0, 1, 1], [], []>} : vector<8x8xf32>, vector<8x16xf32>, vector<8x16xf32> -> vector<8x16xf32>
    %127 = vector.extract_strided_slice %72 {offsets = [0, 24], sizes = [8, 8], strides = [1, 1]} : vector<8x64xf32> to vector<8x8xf32>
    %cst_106 = arith.constant dense<0.000000e+00> : vector<8x16xf32>
    %128 = tpu.matmul %127, %88, %cst_106 {dimension_numbers = #tpu.dot_dimension_numbers<[1], [0], [0], [1], [0, 0, 1, 1], [], []>} : vector<8x8xf32>, vector<8x16xf32>, vector<8x16xf32> -> vector<8x16xf32>
    %129 = arith.addf %126, %128 : vector<8x16xf32>
    %130 = vector.extract_strided_slice %79 {offsets = [0, 24], sizes = [8, 8], strides = [1, 1]} : vector<8x64xf32> to vector<8x8xf32>
    %cst_107 = arith.constant dense<0.000000e+00> : vector<8x16xf32>
    %131 = tpu.matmul %130, %87, %cst_107 {dimension_numbers = #tpu.dot_dimension_numbers<[1], [0], [0], [1], [0, 0, 1, 1], [], []>} : vector<8x8xf32>, vector<8x16xf32>, vector<8x16xf32> -> vector<8x16xf32>
    %132 = vector.extract_strided_slice %86 {offsets = [0, 24], sizes = [8, 8], strides = [1, 1]} : vector<8x64xf32> to vector<8x8xf32>
    %cst_108 = arith.constant dense<0.000000e+00> : vector<8x16xf32>
    %133 = tpu.matmul %132, %88, %cst_108 {dimension_numbers = #tpu.dot_dimension_numbers<[1], [0], [0], [1], [0, 0, 1, 1], [], []>} : vector<8x8xf32>, vector<8x16xf32>, vector<8x16xf32> -> vector<8x16xf32>
    %134 = arith.addf %131, %133 : vector<8x16xf32>
    %c0_109 = arith.constant 0 : index
    %c113 = arith.constant 113 : index
    %135 = vector.load %arg17[%c0_109, %c113] : memref<8x384xf32, #tpu.memory_space<vmem>>, vector<8x16xf32>
    tpu.vector_store %arg17[%c0_109, %c113], %129 {strides = array<i32>} : memref<8x384xf32, #tpu.memory_space<vmem>>, vector<8x16xf32>,
    %c0_110 = arith.constant 0 : index
    %c129 = arith.constant 129 : index
    %136 = vector.load %arg17[%c0_110, %c129] : memref<8x384xf32, #tpu.memory_space<vmem>>, vector<8x16xf32>
    tpu.vector_store %arg17[%c0_110, %c129], %134 {strides = array<i32>} : memref<8x384xf32, #tpu.memory_space<vmem>>, vector<8x16xf32>,
    %137 = vector.extract_strided_slice %65 {offsets = [0, 32], sizes = [8, 8], strides = [1, 1]} : vector<8x64xf32> to vector<8x8xf32>
    %cst_111 = arith.constant dense<0.000000e+00> : vector<8x16xf32>
    %138 = tpu.matmul %137, %87, %cst_111 {dimension_numbers = #tpu.dot_dimension_numbers<[1], [0], [0], [1], [0, 0, 1, 1], [], []>} : vector<8x8xf32>, vector<8x16xf32>, vector<8x16xf32> -> vector<8x16xf32>
    %139 = vector.extract_strided_slice %72 {offsets = [0, 32], sizes = [8, 8], strides = [1, 1]} : vector<8x64xf32> to vector<8x8xf32>
    %cst_112 = arith.constant dense<0.000000e+00> : vector<8x16xf32>
    %140 = tpu.matmul %139, %88, %cst_112 {dimension_numbers = #tpu.dot_dimension_numbers<[1], [0], [0], [1], [0, 0, 1, 1], [], []>} : vector<8x8xf32>, vector<8x16xf32>, vector<8x16xf32> -> vector<8x16xf32>
    %141 = arith.addf %138, %140 : vector<8x16xf32>
    %142 = vector.extract_strided_slice %79 {offsets = [0, 32], sizes = [8, 8], strides = [1, 1]} : vector<8x64xf32> to vector<8x8xf32>
    %cst_113 = arith.constant dense<0.000000e+00> : vector<8x16xf32>
    %143 = tpu.matmul %142, %87, %cst_113 {dimension_numbers = #tpu.dot_dimension_numbers<[1], [0], [0], [1], [0, 0, 1, 1], [], []>} : vector<8x8xf32>, vector<8x16xf32>, vector<8x16xf32> -> vector<8x16xf32>
    %144 = vector.extract_strided_slice %86 {offsets = [0, 32], sizes = [8, 8], strides = [1, 1]} : vector<8x64xf32> to vector<8x8xf32>
    %cst_114 = arith.constant dense<0.000000e+00> : vector<8x16xf32>
    %145 = tpu.matmul %144, %88, %cst_114 {dimension_numbers = #tpu.dot_dimension_numbers<[1], [0], [0], [1], [0, 0, 1, 1], [], []>} : vector<8x8xf32>, vector<8x16xf32>, vector<8x16xf32> -> vector<8x16xf32>
    %146 = arith.addf %143, %145 : vector<8x16xf32>
    %c0_115 = arith.constant 0 : index
    %c145 = arith.constant 145 : index
    %147 = vector.load %arg17[%c0_115, %c145] : memref<8x384xf32, #tpu.memory_space<vmem>>, vector<8x16xf32>
    tpu.vector_store %arg17[%c0_115, %c145], %141 {strides = array<i32>} : memref<8x384xf32, #tpu.memory_space<vmem>>, vector<8x16xf32>,
    %c0_116 = arith.constant 0 : index
    %c161 = arith.constant 161 : index
    %148 = vector.load %arg17[%c0_116, %c161] : memref<8x384xf32, #tpu.memory_space<vmem>>, vector<8x16xf32>
    tpu.vector_store %arg17[%c0_116, %c161], %146 {strides = array<i32>} : memref<8x384xf32, #tpu.memory_space<vmem>>, vector<8x16xf32>,
    %149 = vector.extract_strided_slice %65 {offsets = [0, 40], sizes = [8, 8], strides = [1, 1]} : vector<8x64xf32> to vector<8x8xf32>
    %cst_117 = arith.constant dense<0.000000e+00> : vector<8x16xf32>
    %150 = tpu.matmul %149, %87, %cst_117 {dimension_numbers = #tpu.dot_dimension_numbers<[1], [0], [0], [1], [0, 0, 1, 1], [], []>} : vector<8x8xf32>, vector<8x16xf32>, vector<8x16xf32> -> vector<8x16xf32>
    %151 = vector.extract_strided_slice %72 {offsets = [0, 40], sizes = [8, 8], strides = [1, 1]} : vector<8x64xf32> to vector<8x8xf32>
    %cst_118 = arith.constant dense<0.000000e+00> : vector<8x16xf32>
    %152 = tpu.matmul %151, %88, %cst_118 {dimension_numbers = #tpu.dot_dimension_numbers<[1], [0], [0], [1], [0, 0, 1, 1], [], []>} : vector<8x8xf32>, vector<8x16xf32>, vector<8x16xf32> -> vector<8x16xf32>
    %153 = arith.addf %150, %152 : vector<8x16xf32>
    %154 = vector.extract_strided_slice %79 {offsets = [0, 40], sizes = [8, 8], strides = [1, 1]} : vector<8x64xf32> to vector<8x8xf32>
    %cst_119 = arith.constant dense<0.000000e+00> : vector<8x16xf32>
    %155 = tpu.matmul %154, %87, %cst_119 {dimension_numbers = #tpu.dot_dimension_numbers<[1], [0], [0], [1], [0, 0, 1, 1], [], []>} : vector<8x8xf32>, vector<8x16xf32>, vector<8x16xf32> -> vector<8x16xf32>
    %156 = vector.extract_strided_slice %86 {offsets = [0, 40], sizes = [8, 8], strides = [1, 1]} : vector<8x64xf32> to vector<8x8xf32>
    %cst_120 = arith.constant dense<0.000000e+00> : vector<8x16xf32>
    %157 = tpu.matmul %156, %88, %cst_120 {dimension_numbers = #tpu.dot_dimension_numbers<[1], [0], [0], [1], [0, 0, 1, 1], [], []>} : vector<8x8xf32>, vector<8x16xf32>, vector<8x16xf32> -> vector<8x16xf32>
    %158 = arith.addf %155, %157 : vector<8x16xf32>
    %c0_121 = arith.constant 0 : index
    %c177 = arith.constant 177 : index
    %159 = vector.load %arg17[%c0_121, %c177] : memref<8x384xf32, #tpu.memory_space<vmem>>, vector<8x16xf32>
    tpu.vector_store %arg17[%c0_121, %c177], %153 {strides = array<i32>} : memref<8x384xf32, #tpu.memory_space<vmem>>, vector<8x16xf32>,
    %c0_122 = arith.constant 0 : index
    %c193 = arith.constant 193 : index
    %160 = vector.load %arg17[%c0_122, %c193] : memref<8x384xf32, #tpu.memory_space<vmem>>, vector<8x16xf32>
    tpu.vector_store %arg17[%c0_122, %c193], %158 {strides = array<i32>} : memref<8x384xf32, #tpu.memory_space<vmem>>, vector<8x16xf32>,
    %161 = vector.extract_strided_slice %65 {offsets = [0, 48], sizes = [8, 8], strides = [1, 1]} : vector<8x64xf32> to vector<8x8xf32>
    %cst_123 = arith.constant dense<0.000000e+00> : vector<8x16xf32>
    %162 = tpu.matmul %161, %87, %cst_123 {dimension_numbers = #tpu.dot_dimension_numbers<[1], [0], [0], [1], [0, 0, 1, 1], [], []>} : vector<8x8xf32>, vector<8x16xf32>, vector<8x16xf32> -> vector<8x16xf32>
    %163 = vector.extract_strided_slice %72 {offsets = [0, 48], sizes = [8, 8], strides = [1, 1]} : vector<8x64xf32> to vector<8x8xf32>
    %cst_124 = arith.constant dense<0.000000e+00> : vector<8x16xf32>
    %164 = tpu.matmul %163, %88, %cst_124 {dimension_numbers = #tpu.dot_dimension_numbers<[1], [0], [0], [1], [0, 0, 1, 1], [], []>} : vector<8x8xf32>, vector<8x16xf32>, vector<8x16xf32> -> vector<8x16xf32>
    %165 = arith.addf %162, %164 : vector<8x16xf32>
    %166 = vector.extract_strided_slice %79 {offsets = [0, 48], sizes = [8, 8], strides = [1, 1]} : vector<8x64xf32> to vector<8x8xf32>
    %cst_125 = arith.constant dense<0.000000e+00> : vector<8x16xf32>
    %167 = tpu.matmul %166, %87, %cst_125 {dimension_numbers = #tpu.dot_dimension_numbers<[1], [0], [0], [1], [0, 0, 1, 1], [], []>} : vector<8x8xf32>, vector<8x16xf32>, vector<8x16xf32> -> vector<8x16xf32>
    %168 = vector.extract_strided_slice %86 {offsets = [0, 48], sizes = [8, 8], strides = [1, 1]} : vector<8x64xf32> to vector<8x8xf32>
    %cst_126 = arith.constant dense<0.000000e+00> : vector<8x16xf32>
    %169 = tpu.matmul %168, %88, %cst_126 {dimension_numbers = #tpu.dot_dimension_numbers<[1], [0], [0], [1], [0, 0, 1, 1], [], []>} : vector<8x8xf32>, vector<8x16xf32>, vector<8x16xf32> -> vector<8x16xf32>
    %170 = arith.addf %167, %169 : vector<8x16xf32>
    %c0_127 = arith.constant 0 : index
    %c209 = arith.constant 209 : index
    %171 = vector.load %arg17[%c0_127, %c209] : memref<8x384xf32, #tpu.memory_space<vmem>>, vector<8x16xf32>
    tpu.vector_store %arg17[%c0_127, %c209], %165 {strides = array<i32>} : memref<8x384xf32, #tpu.memory_space<vmem>>, vector<8x16xf32>,
    %c0_128 = arith.constant 0 : index
    %c225 = arith.constant 225 : index
    %172 = vector.load %arg17[%c0_128, %c225] : memref<8x384xf32, #tpu.memory_space<vmem>>, vector<8x16xf32>
    tpu.vector_store %arg17[%c0_128, %c225], %170 {strides = array<i32>} : memref<8x384xf32, #tpu.memory_space<vmem>>, vector<8x16xf32>,
    %173 = vector.extract_strided_slice %65 {offsets = [0, 56], sizes = [8, 8], strides = [1, 1]} : vector<8x64xf32> to vector<8x8xf32>
    %cst_129 = arith.constant dense<0.000000e+00> : vector<8x16xf32>
    %174 = tpu.matmul %173, %87, %cst_129 {dimension_numbers = #tpu.dot_dimension_numbers<[1], [0], [0], [1], [0, 0, 1, 1], [], []>} : vector<8x8xf32>, vector<8x16xf32>, vector<8x16xf32> -> vector<8x16xf32>
    %175 = vector.extract_strided_slice %72 {offsets = [0, 56], sizes = [8, 8], strides = [1, 1]} : vector<8x64xf32> to vector<8x8xf32>
    %cst_130 = arith.constant dense<0.000000e+00> : vector<8x16xf32>
    %176 = tpu.matmul %175, %88, %cst_130 {dimension_numbers = #tpu.dot_dimension_numbers<[1], [0], [0], [1], [0, 0, 1, 1], [], []>} : vector<8x8xf32>, vector<8x16xf32>, vector<8x16xf32> -> vector<8x16xf32>
    %177 = arith.addf %174, %176 : vector<8x16xf32>
    %178 = vector.extract_strided_slice %79 {offsets = [0, 56], sizes = [8, 8], strides = [1, 1]} : vector<8x64xf32> to vector<8x8xf32>
    %cst_131 = arith.constant dense<0.000000e+00> : vector<8x16xf32>
    %179 = tpu.matmul %178, %87, %cst_131 {dimension_numbers = #tpu.dot_dimension_numbers<[1], [0], [0], [1], [0, 0, 1, 1], [], []>} : vector<8x8xf32>, vector<8x16xf32>, vector<8x16xf32> -> vector<8x16xf32>
    %180 = vector.extract_strided_slice %86 {offsets = [0, 56], sizes = [8, 8], strides = [1, 1]} : vector<8x64xf32> to vector<8x8xf32>
    %cst_132 = arith.constant dense<0.000000e+00> : vector<8x16xf32>
    %181 = tpu.matmul %180, %88, %cst_132 {dimension_numbers = #tpu.dot_dimension_numbers<[1], [0], [0], [1], [0, 0, 1, 1], [], []>} : vector<8x8xf32>, vector<8x16xf32>, vector<8x16xf32> -> vector<8x16xf32>
    %182 = arith.addf %179, %181 : vector<8x16xf32>
    %c0_133 = arith.constant 0 : index
    %c241 = arith.constant 241 : index
    %183 = vector.load %arg17[%c0_133, %c241] : memref<8x384xf32, #tpu.memory_space<vmem>>, vector<8x16xf32>
    tpu.vector_store %arg17[%c0_133, %c241], %177 {strides = array<i32>} : memref<8x384xf32, #tpu.memory_space<vmem>>, vector<8x16xf32>,
    %c0_134 = arith.constant 0 : index
    %c257 = arith.constant 257 : index
    %184 = vector.load %arg17[%c0_134, %c257] : memref<8x384xf32, #tpu.memory_space<vmem>>, vector<8x16xf32>
    tpu.vector_store %arg17[%c0_134, %c257], %182 {strides = array<i32>} : memref<8x384xf32, #tpu.memory_space<vmem>>, vector<8x16xf32>,
    %c0_135 = arith.constant 0 : index
    %c0_136 = arith.constant 0 : index
    %c0_137 = arith.constant 0 : index
    %185 = vector.load %arg2[%c0_135, %c0_136, %c0_137] : memref<1x8x256xf32, #tpu.memory_space<vmem>>, vector<1x8x256xf32>
    %186 = vector.shape_cast %185 : vector<1x8x256xf32> to vector<8x256xf32>
    %c0_138 = arith.constant 0 : index
    %c17_139 = arith.constant 17 : index
    %187 = vector.load %arg18[%c0_138, %c17_139] : memref<8x384xf32, #tpu.memory_space<vmem>>, vector<8x256xf32>
    tpu.vector_store %arg18[%c0_138, %c17_139], %186 {strides = array<i32>} : memref<8x384xf32, #tpu.memory_space<vmem>>, vector<8x256xf32>,
    %c0_140 = arith.constant 0 : index
    %c0_141 = arith.constant 0 : index
    %188 = vector.load %arg13[%c0_140, %c0_141] : memref<1x256xf32, #tpu.memory_space<vmem>>, vector<1x256xf32>
    %c0_142 = arith.constant 0 : index
    %c0_143 = arith.constant 0 : index
    %189 = vector.load %arg14[%c0_142, %c0_143] : memref<1x256xf32, #tpu.memory_space<vmem>>, vector<1x256xf32>
    %c0_144 = arith.constant 0 : index
    %c0_145 = arith.constant 0 : index
    %190 = vector.load %arg8[%c0_144, %c0_145] : memref<8x1xf32, #tpu.memory_space<vmem>>, vector<8x1xf32>
    %c0_146 = arith.constant 0 : index
    %c0_147 = arith.constant 0 : index
    %191 = vector.load %arg9[%c0_146, %c0_147] : memref<8x1xf32, #tpu.memory_space<vmem>>, vector<8x1xf32>
    %c0_148 = arith.constant 0 : index
    %c0_149 = arith.constant 0 : index
    %c0_150 = arith.constant 0 : index
    %c0_151 = arith.constant 0 : index
    %192 = vector.load %arg4[%c0_148, %c0_149, %c0_150, %c0_151] : memref<3x3x8x8xf32, #tpu.memory_space<vmem>>, vector<1x1x8x8xf32>
    %193 = vector.shape_cast %192 : vector<1x1x8x8xf32> to vector<8x8xf32>
    %c0_152 = arith.constant 0 : index
    %c0_153 = arith.constant 0 : index
    %194 = vector.load %arg17[%c0_152, %c0_153] : memref<8x384xf32, #tpu.memory_space<vmem>>, vector<8x256xf32>
    %cst_154 = arith.constant dense<0.000000e+00> : vector<8x256xf32>
    %195 = tpu.matmul %193, %194, %cst_154 {dimension_numbers = #tpu.dot_dimension_numbers<[1], [0], [0], [1], [0, 0, 1, 1], [], []>} : vector<8x8xf32>, vector<8x256xf32>, vector<8x256xf32> -> vector<8x256xf32>
    %c0_155 = arith.constant 0 : index
    %c0_156 = arith.constant 0 : index
    %c0_157 = arith.constant 0 : index
    %c0_158 = arith.constant 0 : index
    %196 = vector.load %arg5[%c0_155, %c0_156, %c0_157, %c0_158] : memref<3x3x8x8xf32, #tpu.memory_space<vmem>>, vector<1x1x8x8xf32>
    %197 = vector.shape_cast %196 : vector<1x1x8x8xf32> to vector<8x8xf32>
    %c0_159 = arith.constant 0 : index
    %c0_160 = arith.constant 0 : index
    %198 = vector.load %arg18[%c0_159, %c0_160] : memref<8x384xf32, #tpu.memory_space<vmem>>, vector<8x256xf32>
    %cst_161 = arith.constant dense<0.000000e+00> : vector<8x256xf32>
    %199 = tpu.matmul %197, %198, %cst_161 {dimension_numbers = #tpu.dot_dimension_numbers<[1], [0], [0], [1], [0, 0, 1, 1], [], []>} : vector<8x8xf32>, vector<8x256xf32>, vector<8x256xf32> -> vector<8x256xf32>
    %200 = arith.addf %195, %199 : vector<8x256xf32>
    %c1_162 = arith.constant 1 : index
    %c0_163 = arith.constant 0 : index
    %c0_164 = arith.constant 0 : index
    %c0_165 = arith.constant 0 : index
    %201 = vector.load %arg4[%c1_162, %c0_163, %c0_164, %c0_165] : memref<3x3x8x8xf32, #tpu.memory_space<vmem>>, vector<1x1x8x8xf32>
    %202 = vector.shape_cast %201 : vector<1x1x8x8xf32> to vector<8x8xf32>
    %c0_166 = arith.constant 0 : index
    %c16 = arith.constant 16 : index
    %203 = vector.load %arg17[%c0_166, %c16] : memref<8x384xf32, #tpu.memory_space<vmem>>, vector<8x256xf32>
    %cst_167 = arith.constant dense<0.000000e+00> : vector<8x256xf32>
    %204 = tpu.matmul %202, %203, %cst_167 {dimension_numbers = #tpu.dot_dimension_numbers<[1], [0], [0], [1], [0, 0, 1, 1], [], []>} : vector<8x8xf32>, vector<8x256xf32>, vector<8x256xf32> -> vector<8x256xf32>
    %c1_168 = arith.constant 1 : index
    %c0_169 = arith.constant 0 : index
    %c0_170 = arith.constant 0 : index
    %c0_171 = arith.constant 0 : index
    %205 = vector.load %arg5[%c1_168, %c0_169, %c0_170, %c0_171] : memref<3x3x8x8xf32, #tpu.memory_space<vmem>>, vector<1x1x8x8xf32>
    %206 = vector.shape_cast %205 : vector<1x1x8x8xf32> to vector<8x8xf32>
    %c0_172 = arith.constant 0 : index
    %c16_173 = arith.constant 16 : index
    %207 = vector.load %arg18[%c0_172, %c16_173] : memref<8x384xf32, #tpu.memory_space<vmem>>, vector<8x256xf32>
    %cst_174 = arith.constant dense<0.000000e+00> : vector<8x256xf32>
    %208 = tpu.matmul %206, %207, %cst_174 {dimension_numbers = #tpu.dot_dimension_numbers<[1], [0], [0], [1], [0, 0, 1, 1], [], []>} : vector<8x8xf32>, vector<8x256xf32>, vector<8x256xf32> -> vector<8x256xf32>
    %209 = arith.addf %204, %208 : vector<8x256xf32>
    %210 = arith.addf %200, %209 : vector<8x256xf32>
    %c2_175 = arith.constant 2 : index
    %c0_176 = arith.constant 0 : index
    %c0_177 = arith.constant 0 : index
    %c0_178 = arith.constant 0 : index
    %211 = vector.load %arg4[%c2_175, %c0_176, %c0_177, %c0_178] : memref<3x3x8x8xf32, #tpu.memory_space<vmem>>, vector<1x1x8x8xf32>
    %212 = vector.shape_cast %211 : vector<1x1x8x8xf32> to vector<8x8xf32>
    %c0_179 = arith.constant 0 : index
    %c32 = arith.constant 32 : index
    %213 = vector.load %arg17[%c0_179, %c32] : memref<8x384xf32, #tpu.memory_space<vmem>>, vector<8x256xf32>
    %cst_180 = arith.constant dense<0.000000e+00> : vector<8x256xf32>
    %214 = tpu.matmul %212, %213, %cst_180 {dimension_numbers = #tpu.dot_dimension_numbers<[1], [0], [0], [1], [0, 0, 1, 1], [], []>} : vector<8x8xf32>, vector<8x256xf32>, vector<8x256xf32> -> vector<8x256xf32>
    %c2_181 = arith.constant 2 : index
    %c0_182 = arith.constant 0 : index
    %c0_183 = arith.constant 0 : index
    %c0_184 = arith.constant 0 : index
    %215 = vector.load %arg5[%c2_181, %c0_182, %c0_183, %c0_184] : memref<3x3x8x8xf32, #tpu.memory_space<vmem>>, vector<1x1x8x8xf32>
    %216 = vector.shape_cast %215 : vector<1x1x8x8xf32> to vector<8x8xf32>
    %c0_185 = arith.constant 0 : index
    %c32_186 = arith.constant 32 : index
    %217 = vector.load %arg18[%c0_185, %c32_186] : memref<8x384xf32, #tpu.memory_space<vmem>>, vector<8x256xf32>
    %cst_187 = arith.constant dense<0.000000e+00> : vector<8x256xf32>
    %218 = tpu.matmul %216, %217, %cst_187 {dimension_numbers = #tpu.dot_dimension_numbers<[1], [0], [0], [1], [0, 0, 1, 1], [], []>} : vector<8x8xf32>, vector<8x256xf32>, vector<8x256xf32> -> vector<8x256xf32>
    %219 = arith.addf %214, %218 : vector<8x256xf32>
    %220 = arith.addf %210, %219 : vector<8x256xf32>
    %c0_188 = arith.constant 0 : index
    %c1_189 = arith.constant 1 : index
    %c0_190 = arith.constant 0 : index
    %c0_191 = arith.constant 0 : index
    %221 = vector.load %arg4[%c0_188, %c1_189, %c0_190, %c0_191] : memref<3x3x8x8xf32, #tpu.memory_space<vmem>>, vector<1x1x8x8xf32>
    %222 = vector.shape_cast %221 : vector<1x1x8x8xf32> to vector<8x8xf32>
    %c0_192 = arith.constant 0 : index
    %c1_193 = arith.constant 1 : index
    %223 = vector.load %arg17[%c0_192, %c1_193] : memref<8x384xf32, #tpu.memory_space<vmem>>, vector<8x256xf32>
    %cst_194 = arith.constant dense<0.000000e+00> : vector<8x256xf32>
    %224 = tpu.matmul %222, %223, %cst_194 {dimension_numbers = #tpu.dot_dimension_numbers<[1], [0], [0], [1], [0, 0, 1, 1], [], []>} : vector<8x8xf32>, vector<8x256xf32>, vector<8x256xf32> -> vector<8x256xf32>
    %c0_195 = arith.constant 0 : index
    %c1_196 = arith.constant 1 : index
    %c0_197 = arith.constant 0 : index
    %c0_198 = arith.constant 0 : index
    %225 = vector.load %arg5[%c0_195, %c1_196, %c0_197, %c0_198] : memref<3x3x8x8xf32, #tpu.memory_space<vmem>>, vector<1x1x8x8xf32>
    %226 = vector.shape_cast %225 : vector<1x1x8x8xf32> to vector<8x8xf32>
    %c0_199 = arith.constant 0 : index
    %c1_200 = arith.constant 1 : index
    %227 = vector.load %arg18[%c0_199, %c1_200] : memref<8x384xf32, #tpu.memory_space<vmem>>, vector<8x256xf32>
    %cst_201 = arith.constant dense<0.000000e+00> : vector<8x256xf32>
    %228 = tpu.matmul %226, %227, %cst_201 {dimension_numbers = #tpu.dot_dimension_numbers<[1], [0], [0], [1], [0, 0, 1, 1], [], []>} : vector<8x8xf32>, vector<8x256xf32>, vector<8x256xf32> -> vector<8x256xf32>
    %229 = arith.addf %224, %228 : vector<8x256xf32>
    %c1_202 = arith.constant 1 : index
    %c1_203 = arith.constant 1 : index
    %c0_204 = arith.constant 0 : index
    %c0_205 = arith.constant 0 : index
    %230 = vector.load %arg4[%c1_202, %c1_203, %c0_204, %c0_205] : memref<3x3x8x8xf32, #tpu.memory_space<vmem>>, vector<1x1x8x8xf32>
    %231 = vector.shape_cast %230 : vector<1x1x8x8xf32> to vector<8x8xf32>
    %c0_206 = arith.constant 0 : index
    %c17_207 = arith.constant 17 : index
    %232 = vector.load %arg17[%c0_206, %c17_207] : memref<8x384xf32, #tpu.memory_space<vmem>>, vector<8x256xf32>
    %cst_208 = arith.constant dense<0.000000e+00> : vector<8x256xf32>
    %233 = tpu.matmul %231, %232, %cst_208 {dimension_numbers = #tpu.dot_dimension_numbers<[1], [0], [0], [1], [0, 0, 1, 1], [], []>} : vector<8x8xf32>, vector<8x256xf32>, vector<8x256xf32> -> vector<8x256xf32>
    %c1_209 = arith.constant 1 : index
    %c1_210 = arith.constant 1 : index
    %c0_211 = arith.constant 0 : index
    %c0_212 = arith.constant 0 : index
    %234 = vector.load %arg5[%c1_209, %c1_210, %c0_211, %c0_212] : memref<3x3x8x8xf32, #tpu.memory_space<vmem>>, vector<1x1x8x8xf32>
    %235 = vector.shape_cast %234 : vector<1x1x8x8xf32> to vector<8x8xf32>
    %c0_213 = arith.constant 0 : index
    %c17_214 = arith.constant 17 : index
    %236 = vector.load %arg18[%c0_213, %c17_214] : memref<8x384xf32, #tpu.memory_space<vmem>>, vector<8x256xf32>
    %cst_215 = arith.constant dense<0.000000e+00> : vector<8x256xf32>
    %237 = tpu.matmul %235, %236, %cst_215 {dimension_numbers = #tpu.dot_dimension_numbers<[1], [0], [0], [1], [0, 0, 1, 1], [], []>} : vector<8x8xf32>, vector<8x256xf32>, vector<8x256xf32> -> vector<8x256xf32>
    %238 = arith.addf %233, %237 : vector<8x256xf32>
    %239 = arith.addf %229, %238 : vector<8x256xf32>
    %c2_216 = arith.constant 2 : index
    %c1_217 = arith.constant 1 : index
    %c0_218 = arith.constant 0 : index
    %c0_219 = arith.constant 0 : index
    %240 = vector.load %arg4[%c2_216, %c1_217, %c0_218, %c0_219] : memref<3x3x8x8xf32, #tpu.memory_space<vmem>>, vector<1x1x8x8xf32>
    %241 = vector.shape_cast %240 : vector<1x1x8x8xf32> to vector<8x8xf32>
    %c0_220 = arith.constant 0 : index
    %c33_221 = arith.constant 33 : index
    %242 = vector.load %arg17[%c0_220, %c33_221] : memref<8x384xf32, #tpu.memory_space<vmem>>, vector<8x256xf32>
    %cst_222 = arith.constant dense<0.000000e+00> : vector<8x256xf32>
    %243 = tpu.matmul %241, %242, %cst_222 {dimension_numbers = #tpu.dot_dimension_numbers<[1], [0], [0], [1], [0, 0, 1, 1], [], []>} : vector<8x8xf32>, vector<8x256xf32>, vector<8x256xf32> -> vector<8x256xf32>
    %c2_223 = arith.constant 2 : index
    %c1_224 = arith.constant 1 : index
    %c0_225 = arith.constant 0 : index
    %c0_226 = arith.constant 0 : index
    %244 = vector.load %arg5[%c2_223, %c1_224, %c0_225, %c0_226] : memref<3x3x8x8xf32, #tpu.memory_space<vmem>>, vector<1x1x8x8xf32>
    %245 = vector.shape_cast %244 : vector<1x1x8x8xf32> to vector<8x8xf32>
    %c0_227 = arith.constant 0 : index
    %c33_228 = arith.constant 33 : index
    %246 = vector.load %arg18[%c0_227, %c33_228] : memref<8x384xf32, #tpu.memory_space<vmem>>, vector<8x256xf32>
    %cst_229 = arith.constant dense<0.000000e+00> : vector<8x256xf32>
    %247 = tpu.matmul %245, %246, %cst_229 {dimension_numbers = #tpu.dot_dimension_numbers<[1], [0], [0], [1], [0, 0, 1, 1], [], []>} : vector<8x8xf32>, vector<8x256xf32>, vector<8x256xf32> -> vector<8x256xf32>
    %248 = arith.addf %243, %247 : vector<8x256xf32>
    %249 = arith.addf %239, %248 : vector<8x256xf32>
    %c0_230 = arith.constant 0 : index
    %c2_231 = arith.constant 2 : index
    %c0_232 = arith.constant 0 : index
    %c0_233 = arith.constant 0 : index
    %250 = vector.load %arg4[%c0_230, %c2_231, %c0_232, %c0_233] : memref<3x3x8x8xf32, #tpu.memory_space<vmem>>, vector<1x1x8x8xf32>
    %251 = vector.shape_cast %250 : vector<1x1x8x8xf32> to vector<8x8xf32>
    %c0_234 = arith.constant 0 : index
    %c2_235 = arith.constant 2 : index
    %252 = vector.load %arg17[%c0_234, %c2_235] : memref<8x384xf32, #tpu.memory_space<vmem>>, vector<8x256xf32>
    %cst_236 = arith.constant dense<0.000000e+00> : vector<8x256xf32>
    %253 = tpu.matmul %251, %252, %cst_236 {dimension_numbers = #tpu.dot_dimension_numbers<[1], [0], [0], [1], [0, 0, 1, 1], [], []>} : vector<8x8xf32>, vector<8x256xf32>, vector<8x256xf32> -> vector<8x256xf32>
    %c0_237 = arith.constant 0 : index
    %c2_238 = arith.constant 2 : index
    %c0_239 = arith.constant 0 : index
    %c0_240 = arith.constant 0 : index
    %254 = vector.load %arg5[%c0_237, %c2_238, %c0_239, %c0_240] : memref<3x3x8x8xf32, #tpu.memory_space<vmem>>, vector<1x1x8x8xf32>
    %255 = vector.shape_cast %254 : vector<1x1x8x8xf32> to vector<8x8xf32>
    %c0_241 = arith.constant 0 : index
    %c2_242 = arith.constant 2 : index
    %256 = vector.load %arg18[%c0_241, %c2_242] : memref<8x384xf32, #tpu.memory_space<vmem>>, vector<8x256xf32>
    %cst_243 = arith.constant dense<0.000000e+00> : vector<8x256xf32>
    %257 = tpu.matmul %255, %256, %cst_243 {dimension_numbers = #tpu.dot_dimension_numbers<[1], [0], [0], [1], [0, 0, 1, 1], [], []>} : vector<8x8xf32>, vector<8x256xf32>, vector<8x256xf32> -> vector<8x256xf32>
    %258 = arith.addf %253, %257 : vector<8x256xf32>
    %c1_244 = arith.constant 1 : index
    %c2_245 = arith.constant 2 : index
    %c0_246 = arith.constant 0 : index
    %c0_247 = arith.constant 0 : index
    %259 = vector.load %arg4[%c1_244, %c2_245, %c0_246, %c0_247] : memref<3x3x8x8xf32, #tpu.memory_space<vmem>>, vector<1x1x8x8xf32>
    %260 = vector.shape_cast %259 : vector<1x1x8x8xf32> to vector<8x8xf32>
    %c0_248 = arith.constant 0 : index
    %c18 = arith.constant 18 : index
    %261 = vector.load %arg17[%c0_248, %c18] : memref<8x384xf32, #tpu.memory_space<vmem>>, vector<8x256xf32>
    %cst_249 = arith.constant dense<0.000000e+00> : vector<8x256xf32>
    %262 = tpu.matmul %260, %261, %cst_249 {dimension_numbers = #tpu.dot_dimension_numbers<[1], [0], [0], [1], [0, 0, 1, 1], [], []>} : vector<8x8xf32>, vector<8x256xf32>, vector<8x256xf32> -> vector<8x256xf32>
    %c1_250 = arith.constant 1 : index
    %c2_251 = arith.constant 2 : index
    %c0_252 = arith.constant 0 : index
    %c0_253 = arith.constant 0 : index
    %263 = vector.load %arg5[%c1_250, %c2_251, %c0_252, %c0_253] : memref<3x3x8x8xf32, #tpu.memory_space<vmem>>, vector<1x1x8x8xf32>
    %264 = vector.shape_cast %263 : vector<1x1x8x8xf32> to vector<8x8xf32>
    %c0_254 = arith.constant 0 : index
    %c18_255 = arith.constant 18 : index
    %265 = vector.load %arg18[%c0_254, %c18_255] : memref<8x384xf32, #tpu.memory_space<vmem>>, vector<8x256xf32>
    %cst_256 = arith.constant dense<0.000000e+00> : vector<8x256xf32>
    %266 = tpu.matmul %264, %265, %cst_256 {dimension_numbers = #tpu.dot_dimension_numbers<[1], [0], [0], [1], [0, 0, 1, 1], [], []>} : vector<8x8xf32>, vector<8x256xf32>, vector<8x256xf32> -> vector<8x256xf32>
    %267 = arith.addf %262, %266 : vector<8x256xf32>
    %268 = arith.addf %258, %267 : vector<8x256xf32>
    %c2_257 = arith.constant 2 : index
    %c2_258 = arith.constant 2 : index
    %c0_259 = arith.constant 0 : index
    %c0_260 = arith.constant 0 : index
    %269 = vector.load %arg4[%c2_257, %c2_258, %c0_259, %c0_260] : memref<3x3x8x8xf32, #tpu.memory_space<vmem>>, vector<1x1x8x8xf32>
    %270 = vector.shape_cast %269 : vector<1x1x8x8xf32> to vector<8x8xf32>
    %c0_261 = arith.constant 0 : index
    %c34 = arith.constant 34 : index
    %271 = vector.load %arg17[%c0_261, %c34] : memref<8x384xf32, #tpu.memory_space<vmem>>, vector<8x256xf32>
    %cst_262 = arith.constant dense<0.000000e+00> : vector<8x256xf32>
    %272 = tpu.matmul %270, %271, %cst_262 {dimension_numbers = #tpu.dot_dimension_numbers<[1], [0], [0], [1], [0, 0, 1, 1], [], []>} : vector<8x8xf32>, vector<8x256xf32>, vector<8x256xf32> -> vector<8x256xf32>
    %c2_263 = arith.constant 2 : index
    %c2_264 = arith.constant 2 : index
    %c0_265 = arith.constant 0 : index
    %c0_266 = arith.constant 0 : index
    %273 = vector.load %arg5[%c2_263, %c2_264, %c0_265, %c0_266] : memref<3x3x8x8xf32, #tpu.memory_space<vmem>>, vector<1x1x8x8xf32>
    %274 = vector.shape_cast %273 : vector<1x1x8x8xf32> to vector<8x8xf32>
    %c0_267 = arith.constant 0 : index
    %c34_268 = arith.constant 34 : index
    %275 = vector.load %arg18[%c0_267, %c34_268] : memref<8x384xf32, #tpu.memory_space<vmem>>, vector<8x256xf32>
    %cst_269 = arith.constant dense<0.000000e+00> : vector<8x256xf32>
    %276 = tpu.matmul %274, %275, %cst_269 {dimension_numbers = #tpu.dot_dimension_numbers<[1], [0], [0], [1], [0, 0, 1, 1], [], []>} : vector<8x8xf32>, vector<8x256xf32>, vector<8x256xf32> -> vector<8x256xf32>
    %277 = arith.addf %272, %276 : vector<8x256xf32>
    %278 = arith.addf %268, %277 : vector<8x256xf32>
    %279 = vector.broadcast %188 : vector<1x256xf32> to vector<8x256xf32>
    %280 = arith.mulf %279, %220 : vector<8x256xf32>
    %281 = arith.addf %280, %249 : vector<8x256xf32>
    %282 = vector.broadcast %189 : vector<1x256xf32> to vector<8x256xf32>
    %283 = arith.mulf %282, %278 : vector<8x256xf32>
    %284 = arith.addf %281, %283 : vector<8x256xf32>
    %285 = vector.broadcast %190 : vector<8x1xf32> to vector<8x256xf32>
    %286 = arith.addf %284, %285 : vector<8x256xf32>
    %cst_270 = arith.constant 0.000000e+00 : f32
    %287 = vector.broadcast %cst_270 : f32 to vector<8x256xf32>
    %288 = arith.cmpf ogt, %286, %287 : vector<8x256xf32>
    %cst_271 = arith.constant 2.000000e-01 : f32
    %289 = vector.broadcast %cst_271 : f32 to vector<8x256xf32>
    %290 = arith.mulf %289, %286 : vector<8x256xf32>
    %291 = arith.select %288, %286, %290 : vector<8x256xi1>, vector<8x256xf32>
    %c0_272 = arith.constant 0 : index
    %c17_273 = arith.constant 17 : index
    %292 = vector.load %arg19[%c0_272, %c17_273] : memref<8x384xf32, #tpu.memory_space<vmem>>, vector<8x256xf32>
    tpu.vector_store %arg19[%c0_272, %c17_273], %291 {strides = array<i32>} : memref<8x384xf32, #tpu.memory_space<vmem>>, vector<8x256xf32>,
    %c0_274 = arith.constant 0 : index
    %c0_275 = arith.constant 0 : index
    %c0_276 = arith.constant 0 : index
    %c0_277 = arith.constant 0 : index
    %293 = vector.load %arg6[%c0_274, %c0_275, %c0_276, %c0_277] : memref<3x3x8x8xf32, #tpu.memory_space<vmem>>, vector<1x1x8x8xf32>
    %294 = vector.shape_cast %293 : vector<1x1x8x8xf32> to vector<8x8xf32>
    %c0_278 = arith.constant 0 : index
    %c0_279 = arith.constant 0 : index
    %295 = vector.load %arg19[%c0_278, %c0_279] : memref<8x384xf32, #tpu.memory_space<vmem>>, vector<8x256xf32>
    %cst_280 = arith.constant dense<0.000000e+00> : vector<8x256xf32>
    %296 = tpu.matmul %294, %295, %cst_280 {dimension_numbers = #tpu.dot_dimension_numbers<[1], [0], [0], [1], [0, 0, 1, 1], [], []>} : vector<8x8xf32>, vector<8x256xf32>, vector<8x256xf32> -> vector<8x256xf32>
    %c1_281 = arith.constant 1 : index
    %c0_282 = arith.constant 0 : index
    %c0_283 = arith.constant 0 : index
    %c0_284 = arith.constant 0 : index
    %297 = vector.load %arg6[%c1_281, %c0_282, %c0_283, %c0_284] : memref<3x3x8x8xf32, #tpu.memory_space<vmem>>, vector<1x1x8x8xf32>
    %298 = vector.shape_cast %297 : vector<1x1x8x8xf32> to vector<8x8xf32>
    %c0_285 = arith.constant 0 : index
    %c16_286 = arith.constant 16 : index
    %299 = vector.load %arg19[%c0_285, %c16_286] : memref<8x384xf32, #tpu.memory_space<vmem>>, vector<8x256xf32>
    %cst_287 = arith.constant dense<0.000000e+00> : vector<8x256xf32>
    %300 = tpu.matmul %298, %299, %cst_287 {dimension_numbers = #tpu.dot_dimension_numbers<[1], [0], [0], [1], [0, 0, 1, 1], [], []>} : vector<8x8xf32>, vector<8x256xf32>, vector<8x256xf32> -> vector<8x256xf32>
    %301 = arith.addf %296, %300 : vector<8x256xf32>
    %c2_288 = arith.constant 2 : index
    %c0_289 = arith.constant 0 : index
    %c0_290 = arith.constant 0 : index
    %c0_291 = arith.constant 0 : index
    %302 = vector.load %arg6[%c2_288, %c0_289, %c0_290, %c0_291] : memref<3x3x8x8xf32, #tpu.memory_space<vmem>>, vector<1x1x8x8xf32>
    %303 = vector.shape_cast %302 : vector<1x1x8x8xf32> to vector<8x8xf32>
    %c0_292 = arith.constant 0 : index
    %c32_293 = arith.constant 32 : index
    %304 = vector.load %arg19[%c0_292, %c32_293] : memref<8x384xf32, #tpu.memory_space<vmem>>, vector<8x256xf32>
    %cst_294 = arith.constant dense<0.000000e+00> : vector<8x256xf32>
    %305 = tpu.matmul %303, %304, %cst_294 {dimension_numbers = #tpu.dot_dimension_numbers<[1], [0], [0], [1], [0, 0, 1, 1], [], []>} : vector<8x8xf32>, vector<8x256xf32>, vector<8x256xf32> -> vector<8x256xf32>
    %306 = arith.addf %301, %305 : vector<8x256xf32>
    %c0_295 = arith.constant 0 : index
    %c1_296 = arith.constant 1 : index
    %c0_297 = arith.constant 0 : index
    %c0_298 = arith.constant 0 : index
    %307 = vector.load %arg6[%c0_295, %c1_296, %c0_297, %c0_298] : memref<3x3x8x8xf32, #tpu.memory_space<vmem>>, vector<1x1x8x8xf32>
    %308 = vector.shape_cast %307 : vector<1x1x8x8xf32> to vector<8x8xf32>
    %c0_299 = arith.constant 0 : index
    %c1_300 = arith.constant 1 : index
    %309 = vector.load %arg19[%c0_299, %c1_300] : memref<8x384xf32, #tpu.memory_space<vmem>>, vector<8x256xf32>
    %cst_301 = arith.constant dense<0.000000e+00> : vector<8x256xf32>
    %310 = tpu.matmul %308, %309, %cst_301 {dimension_numbers = #tpu.dot_dimension_numbers<[1], [0], [0], [1], [0, 0, 1, 1], [], []>} : vector<8x8xf32>, vector<8x256xf32>, vector<8x256xf32> -> vector<8x256xf32>
    %c1_302 = arith.constant 1 : index
    %c1_303 = arith.constant 1 : index
    %c0_304 = arith.constant 0 : index
    %c0_305 = arith.constant 0 : index
    %311 = vector.load %arg6[%c1_302, %c1_303, %c0_304, %c0_305] : memref<3x3x8x8xf32, #tpu.memory_space<vmem>>, vector<1x1x8x8xf32>
    %312 = vector.shape_cast %311 : vector<1x1x8x8xf32> to vector<8x8xf32>
    %c0_306 = arith.constant 0 : index
    %c17_307 = arith.constant 17 : index
    %313 = vector.load %arg19[%c0_306, %c17_307] : memref<8x384xf32, #tpu.memory_space<vmem>>, vector<8x256xf32>
    %cst_308 = arith.constant dense<0.000000e+00> : vector<8x256xf32>
    %314 = tpu.matmul %312, %313, %cst_308 {dimension_numbers = #tpu.dot_dimension_numbers<[1], [0], [0], [1], [0, 0, 1, 1], [], []>} : vector<8x8xf32>, vector<8x256xf32>, vector<8x256xf32> -> vector<8x256xf32>
    %315 = arith.addf %310, %314 : vector<8x256xf32>
    %c2_309 = arith.constant 2 : index
    %c1_310 = arith.constant 1 : index
    %c0_311 = arith.constant 0 : index
    %c0_312 = arith.constant 0 : index
    %316 = vector.load %arg6[%c2_309, %c1_310, %c0_311, %c0_312] : memref<3x3x8x8xf32, #tpu.memory_space<vmem>>, vector<1x1x8x8xf32>
    %317 = vector.shape_cast %316 : vector<1x1x8x8xf32> to vector<8x8xf32>
    %c0_313 = arith.constant 0 : index
    %c33_314 = arith.constant 33 : index
    %318 = vector.load %arg19[%c0_313, %c33_314] : memref<8x384xf32, #tpu.memory_space<vmem>>, vector<8x256xf32>
    %cst_315 = arith.constant dense<0.000000e+00> : vector<8x256xf32>
    %319 = tpu.matmul %317, %318, %cst_315 {dimension_numbers = #tpu.dot_dimension_numbers<[1], [0], [0], [1], [0, 0, 1, 1], [], []>} : vector<8x8xf32>, vector<8x256xf32>, vector<8x256xf32> -> vector<8x256xf32>
    %320 = arith.addf %315, %319 : vector<8x256xf32>
    %c0_316 = arith.constant 0 : index
    %c2_317 = arith.constant 2 : index
    %c0_318 = arith.constant 0 : index
    %c0_319 = arith.constant 0 : index
    %321 = vector.load %arg6[%c0_316, %c2_317, %c0_318, %c0_319] : memref<3x3x8x8xf32, #tpu.memory_space<vmem>>, vector<1x1x8x8xf32>
    %322 = vector.shape_cast %321 : vector<1x1x8x8xf32> to vector<8x8xf32>
    %c0_320 = arith.constant 0 : index
    %c2_321 = arith.constant 2 : index
    %323 = vector.load %arg19[%c0_320, %c2_321] : memref<8x384xf32, #tpu.memory_space<vmem>>, vector<8x256xf32>
    %cst_322 = arith.constant dense<0.000000e+00> : vector<8x256xf32>
    %324 = tpu.matmul %322, %323, %cst_322 {dimension_numbers = #tpu.dot_dimension_numbers<[1], [0], [0], [1], [0, 0, 1, 1], [], []>} : vector<8x8xf32>, vector<8x256xf32>, vector<8x256xf32> -> vector<8x256xf32>
    %c1_323 = arith.constant 1 : index
    %c2_324 = arith.constant 2 : index
    %c0_325 = arith.constant 0 : index
    %c0_326 = arith.constant 0 : index
    %325 = vector.load %arg6[%c1_323, %c2_324, %c0_325, %c0_326] : memref<3x3x8x8xf32, #tpu.memory_space<vmem>>, vector<1x1x8x8xf32>
    %326 = vector.shape_cast %325 : vector<1x1x8x8xf32> to vector<8x8xf32>
    %c0_327 = arith.constant 0 : index
    %c18_328 = arith.constant 18 : index
    %327 = vector.load %arg19[%c0_327, %c18_328] : memref<8x384xf32, #tpu.memory_space<vmem>>, vector<8x256xf32>
    %cst_329 = arith.constant dense<0.000000e+00> : vector<8x256xf32>
    %328 = tpu.matmul %326, %327, %cst_329 {dimension_numbers = #tpu.dot_dimension_numbers<[1], [0], [0], [1], [0, 0, 1, 1], [], []>} : vector<8x8xf32>, vector<8x256xf32>, vector<8x256xf32> -> vector<8x256xf32>
    %329 = arith.addf %324, %328 : vector<8x256xf32>
    %c2_330 = arith.constant 2 : index
    %c2_331 = arith.constant 2 : index
    %c0_332 = arith.constant 0 : index
    %c0_333 = arith.constant 0 : index
    %330 = vector.load %arg6[%c2_330, %c2_331, %c0_332, %c0_333] : memref<3x3x8x8xf32, #tpu.memory_space<vmem>>, vector<1x1x8x8xf32>
    %331 = vector.shape_cast %330 : vector<1x1x8x8xf32> to vector<8x8xf32>
    %c0_334 = arith.constant 0 : index
    %c34_335 = arith.constant 34 : index
    %332 = vector.load %arg19[%c0_334, %c34_335] : memref<8x384xf32, #tpu.memory_space<vmem>>, vector<8x256xf32>
    %cst_336 = arith.constant dense<0.000000e+00> : vector<8x256xf32>
    %333 = tpu.matmul %331, %332, %cst_336 {dimension_numbers = #tpu.dot_dimension_numbers<[1], [0], [0], [1], [0, 0, 1, 1], [], []>} : vector<8x8xf32>, vector<8x256xf32>, vector<8x256xf32> -> vector<8x256xf32>
    %334 = arith.addf %329, %333 : vector<8x256xf32>
    %335 = vector.broadcast %188 : vector<1x256xf32> to vector<8x256xf32>
    %336 = arith.mulf %335, %306 : vector<8x256xf32>
    %337 = arith.addf %336, %320 : vector<8x256xf32>
    %338 = vector.broadcast %189 : vector<1x256xf32> to vector<8x256xf32>
    %339 = arith.mulf %338, %334 : vector<8x256xf32>
    %340 = arith.addf %337, %339 : vector<8x256xf32>
    %341 = vector.broadcast %191 : vector<8x1xf32> to vector<8x256xf32>
    %342 = arith.addf %340, %341 : vector<8x256xf32>
    %cst_337 = arith.constant 0.000000e+00 : f32
    %343 = vector.broadcast %cst_337 : f32 to vector<8x256xf32>
    %344 = arith.cmpf ogt, %342, %343 : vector<8x256xf32>
    %cst_338 = arith.constant 2.000000e-01 : f32
    %345 = vector.broadcast %cst_338 : f32 to vector<8x256xf32>
    %346 = arith.mulf %345, %342 : vector<8x256xf32>
    %347 = arith.select %344, %342, %346 : vector<8x256xi1>, vector<8x256xf32>
    %c0_339 = arith.constant 0 : index
    %c0_340 = arith.constant 0 : index
    %c0_341 = arith.constant 0 : index
    %348 = vector.load %arg15[%c0_339, %c0_340, %c0_341] : memref<1x8x256xf32, #tpu.memory_space<vmem>>, vector<1x8x256xf32>
    %349 = vector.shape_cast %348 : vector<1x8x256xf32> to vector<8x256xf32>
    %350 = vector.shape_cast %347 : vector<8x256xf32> to vector<1x8x256xf32>
    tpu.vector_store %arg15[%c0_339, %c0_340, %c0_341], %350 {strides = array<i32>} : memref<1x8x256xf32, #tpu.memory_space<vmem>>, vector<1x8x256xf32>,
    return
  }
  func.func @transform_0(%arg0: i32) -> (i32, i32, i32) {
    %c0_i32 = arith.constant 0 : i32
    %c0_i32_0 = arith.constant 0 : i32
    %c0_i32_1 = arith.constant 0 : i32
    return %arg0, %c0_i32, %c0_i32_0 : i32, i32, i32
  }
  func.func @transform_1(%arg0: i32) -> (i32, i32, i32) {
    %c0_i32 = arith.constant 0 : i32
    %c0_i32_0 = arith.constant 0 : i32
    %c0_i32_1 = arith.constant 0 : i32
    return %arg0, %c0_i32, %c0_i32_0 : i32, i32, i32
  }
  func.func @transform_2(%arg0: i32) -> (i32, i32, i32, i32) {
    %c0_i32 = arith.constant 0 : i32
    %c0_i32_0 = arith.constant 0 : i32
    %c0_i32_1 = arith.constant 0 : i32
    %c0_i32_2 = arith.constant 0 : i32
    %c0_i32_3 = arith.constant 0 : i32
    return %c0_i32, %c0_i32_0, %c0_i32_1, %c0_i32_2 : i32, i32, i32, i32
  }
  func.func @transform_3(%arg0: i32) -> (i32, i32, i32, i32) {
    %c0_i32 = arith.constant 0 : i32
    %c0_i32_0 = arith.constant 0 : i32
    %c0_i32_1 = arith.constant 0 : i32
    %c0_i32_2 = arith.constant 0 : i32
    %c0_i32_3 = arith.constant 0 : i32
    return %c0_i32, %c0_i32_0, %c0_i32_1, %c0_i32_2 : i32, i32, i32, i32
  }
  func.func @transform_4(%arg0: i32) -> (i32, i32, i32, i32) {
    %c0_i32 = arith.constant 0 : i32
    %c0_i32_0 = arith.constant 0 : i32
    %c0_i32_1 = arith.constant 0 : i32
    %c0_i32_2 = arith.constant 0 : i32
    %c0_i32_3 = arith.constant 0 : i32
    return %c0_i32, %c0_i32_0, %c0_i32_1, %c0_i32_2 : i32, i32, i32, i32
  }
  func.func @transform_5(%arg0: i32) -> (i32, i32, i32, i32) {
    %c0_i32 = arith.constant 0 : i32
    %c0_i32_0 = arith.constant 0 : i32
    %c0_i32_1 = arith.constant 0 : i32
    %c0_i32_2 = arith.constant 0 : i32
    %c0_i32_3 = arith.constant 0 : i32
    return %c0_i32, %c0_i32_0, %c0_i32_1, %c0_i32_2 : i32, i32, i32, i32
  }
  func.func @transform_6(%arg0: i32) -> (i32, i32) {
    %c0_i32 = arith.constant 0 : i32
    %c0_i32_0 = arith.constant 0 : i32
    %c0_i32_1 = arith.constant 0 : i32
    return %c0_i32, %c0_i32_0 : i32, i32
  }
  func.func @transform_7(%arg0: i32) -> (i32, i32) {
    %c0_i32 = arith.constant 0 : i32
    %c0_i32_0 = arith.constant 0 : i32
    %c0_i32_1 = arith.constant 0 : i32
    return %c0_i32, %c0_i32_0 : i32, i32
  }
  func.func @transform_8(%arg0: i32) -> (i32, i32) {
    %c0_i32 = arith.constant 0 : i32
    %c0_i32_0 = arith.constant 0 : i32
    %c0_i32_1 = arith.constant 0 : i32
    return %c0_i32, %c0_i32_0 : i32, i32
  }
  func.func @transform_9(%arg0: i32) -> (i32, i32) {
    %c0_i32 = arith.constant 0 : i32
    %c0_i32_0 = arith.constant 0 : i32
    %c0_i32_1 = arith.constant 0 : i32
    return %c0_i32, %c0_i32_0 : i32, i32
  }
  func.func @transform_10(%arg0: i32) -> (i32, i32) {
    %c0_i32 = arith.constant 0 : i32
    %c0_i32_0 = arith.constant 0 : i32
    %c0_i32_1 = arith.constant 0 : i32
    return %c0_i32, %c0_i32_0 : i32, i32
  }
  func.func @transform_11(%arg0: i32) -> (i32, i32) {
    %c0_i32 = arith.constant 0 : i32
    %c0_i32_0 = arith.constant 0 : i32
    %c0_i32_1 = arith.constant 0 : i32
    return %c0_i32, %c0_i32_0 : i32, i32
  }
  func.func @transform_12(%arg0: i32) -> (i32, i32) {
    %c0_i32 = arith.constant 0 : i32
    %c0_i32_0 = arith.constant 0 : i32
    %c0_i32_1 = arith.constant 0 : i32
    return %c0_i32, %c0_i32_0 : i32, i32
  }
  func.func @transform_13(%arg0: i32) -> (i32, i32) {
    %c0_i32 = arith.constant 0 : i32
    %c0_i32_0 = arith.constant 0 : i32
    %c0_i32_1 = arith.constant 0 : i32
    return %c0_i32, %c0_i32_0 : i32, i32
  }
  func.func @transform_14(%arg0: i32) -> (i32, i32, i32) {
    %c0_i32 = arith.constant 0 : i32
    %c0_i32_0 = arith.constant 0 : i32
    %c0_i32_1 = arith.constant 0 : i32
    return %arg0, %c0_i32, %c0_i32_0 : i32, i32, i32
  }
}

</mosaic_0001>

<bundles_post_ra>
// kernel: decoder_forward.1
= control target key start
LH: loop header
LB: loop body
LE: loop exit
PB: predicated region body
PF: predicated region fallthrough
CT: control target
= control target key end

     0   :  { %s6888_s29 = smov 0   ;;  %s7567_s0 = inlined_call_operand.vmem [shape: f32[2,16,64], index: 0, kind: input, shape index: {}]   ;;  %s7568_s1 = inlined_call_operand.vmem [shape: f32[2,8,256], index: 1, kind: input, shape index: {}]   ;;  %s7569_s2 = inlined_call_operand.vmem [shape: f32[3,3,8,16], index: 2, kind: input, shape index: {}]   ;;  %s7570_s3 = inlined_call_operand.vmem [shape: f32[3,3,8,8], index: 3, kind: input, shape index: {}]   ;;  %s7571_s4 = inlined_call_operand.vmem [shape: f32[3,3,8,8], index: 4, kind: input, shape index: {}]   ;;  %s7572_s5 = inlined_call_operand.vmem [shape: f32[3,3,8,8], index: 5, kind: input, shape index: {}]   ;;  %s7573_s6 = inlined_call_operand.vmem [shape: f32[8,1], index: 6, kind: input, shape index: {}]   ;;  %s7574_s7 = inlined_call_operand.vmem [shape: f32[8,1], index: 7, kind: input, shape index: {}]   ;;  %s7575_s8 = inlined_call_operand.vmem [shape: f32[8,1], index: 8, kind: input, shape index: {}]   ;;  %s7576_s9 = inlined_call_operand.vmem [shape: f32[8,16], index: 9, kind: input, shape index: {}]   ;;  %s7577_s10 = inlined_call_operand.vmem [shape: f32[8,16], index: 10, kind: input, shape index: {}]   ;;  %s7578_s11 = inlined_call_operand.vmem [shape: f32[1,64], index: 11, kind: input, shape index: {}]   ;;  %s7579_s12 = inlined_call_operand.vmem [shape: f32[1,256], index: 12, kind: input, shape index: {}]   ;;  %s7580_s13 = inlined_call_operand.vmem [shape: f32[1,256], index: 13, kind: input, shape index: {}]   ;;  %s7581_s14 = inlined_call_operand.vmem [shape: f32[2,8,256], index: 14, kind: output, shape index: {}]  }
   0x1 LB: > { %s6194_s30 = sadd.s32 4294967295, %s6785_s29   ;;  %p6198_p0 = scmp.ge.s32.totalorder %s6785_s29, 1  ;;  %s6785_s29 = sphi %s6888_s29, %s24_s29  }
   0x2   : > { %p422_p1 = scmp.lt.s32.totalorder %s6785_s29, 3 }
   0x4   : > { %p423_p2 = pnand %p6198_p0, %p422_p1 }
   0x5   : > { %p473_p3 = scmp.lt.s32.totalorder (!%p423_p2), %s6194_s30, 1  ;;  %vm488_vm0 = vcmask (!%p423_p2), 1048064   ;;  %v6787_v0 = vmov (!%p423_p2), 0.0   ;;  %vm501_vm1 = vcmask (!%p423_p2), 523264   ;;  %v6788_v1 = vmov (!%p423_p2), 0.0|0.0   ;;  %s6790_s19 = smov (!%p423_p2), 127  }
   0x6   : > { %426 = sbr.rel (%p423_p2) target bundleno = 1838 (0x72e), region = 76  ;;  %489 = vst.msk [vmem:[#allocation2] sm:$0xff] (!%p423_p2), %vm488_vm0, %v6787_v0  ;;  %490 = vst.msk [vmem:[#allocation2 + $0x8] sm:$0xff] (!%p423_p2), %vm488_vm0, %v6787_v0  ;;  %6625 = vmatprep.subr.bf16.mxu0 (!%p423_p2), %v6788_v1  ;;  %6634 = vmatprep.subr.bf16.mxu1 (!%p423_p2), %v6788_v1  ;;  %vm6789_vm2 = vmmov (!%p423_p2), 0   ;;  %s6791_s20 = smov (!%p423_p2), 119   ;;  %v6211_v8 = vld [vmem:[%s7569_s2 + $0x38] sm:$0xff] (!%p423_p2) }
   0x7   : > { %6406 = vmatprep.mubr.msk.f32.mxu0 (!%p423_p2), %vm6789_vm2, %v6787_v0  ;;  %6427 = vmatprep.mubr.msk.f32.mxu1 (!%p423_p2), %vm6789_vm2, %v6787_v0  ;;  %vm522_vm3 = vcmask (!%p423_p2), 130048   ;;  %s6792_s23 = smov (!%p423_p2), 120   ;;  %v6215_v9 = vld [vmem:[%s7569_s2 + $0x40] sm:$0xff] (!%p423_p2)  ;;  %v6793_v12 = vmov (!%p423_p2), 0   ;;  %v6207_v20 = vld [vmem:[%s7569_s2 + $0x18] sm:$0xff] (!%p423_p2)  ;;  %v6206_v22 = vld [vmem:[%s7569_s2 + $0x28] sm:$0xff] (!%p423_p2) }
   0x8   : > { %v6205_v10 = vld [vmem:[%s7569_s2 + $0x20] sm:$0xff] (!%p423_p2)  ;;  %6777 = vset.pattern.permute.xlu1 (!%p423_p2), %v6793_v12  ;;  %6778 = vset.pattern.permute.xlu0 (!%p423_p2), %v6793_v12  ;;  %v6212_v26 = vld [vmem:[%s7569_s2 + $0x8] sm:$0xff] (!%p423_p2)  ;;  %v6216_v28 = vld [vmem:[%s7569_s2 + $0x10] sm:$0xff] (!%p423_p2)  ;;  %vm1234_vm4 = vcmask (!%p423_p2), 64512   ;;  %s6794_s24 = smov (!%p423_p2), 112   ;;  %s6795_s25 = smov (!%p423_p2), 104  }
   0x9   : > { %v507_v11 = vld [vmem:[%s7573_s6] sm:$0xff] (!%p423_p2)  ;;  %v6219_v30 = vld [vmem:[%s7569_s2 + $0x30] sm:$0xff] (!%p423_p2)  ;;  %s6796_s26 = smov (!%p423_p2), 96   ;;  %s6797_s27 = smov (!%p423_p2), 88   ;;  %vm491_vm9 = vcmask (!%p423_p2), 138240   ;;  %vm493_vm10 = vcmask (!%p423_p2), 1047688  }
   0xa   : > { %v984_v29 = vld [vmem:[%s7569_s2] sm:$0xff] (!%p423_p2)  ;;  %s6799_s28 = smov (!%p423_p2), 72   ;;  %496 = vst.msk [vmem:[#allocation4 + $0x10] sm:$0xff] (!%p423_p2), %vm493_vm10, %v6787_v0  ;;  %494 = vst.msk [vmem:[#allocation3 + $0x10] sm:$0xff] (!%p423_p2), %vm493_vm10, %v6787_v0  ;;  %vm1531_vm11 = vcmask (!%p423_p2), 269448   ;;  %s6802_s21 = smov (!%p423_p2), 49  }
   0xb   : > { %v6981_v32 = vld [vmem:[%s7577_s10] sm:$0xff] (!%p423_p2)  ;;  %492 = vst.msk [vmem:[#allocation3] sm:$0xff] (!%p423_p2), %vm491_vm9, %v6787_v0  ;;  %495 = vst.msk [vmem:[#allocation4] sm:$0xff] (!%p423_p2), %vm491_vm9, %v6787_v0  ;;  %s6803_s22 = smov (!%p423_p2), 81   ;;  %vm1537_vm12 = vcmask (!%p423_p2), 400648   ;;  %s6807_s16 = smov (!%p423_p2), 97  }
   0xc   : > { %v6209_v38 = vld [vmem:[%s7578_s11] ss:$0 sm:$0xff] (!%p423_p2)  ;;  %497 = vst.msk [vmem:[#allocation5] sm:$0xff] (!%p423_p2), %vm491_vm9, %v6787_v0  ;;  %vm1839_vm13 = vcmask (!%p423_p2), 531848   ;;  %vm1845_vm14 = vcmask (!%p423_p2), 663048   ;;  %vm2147_vm15 = vcmask (!%p423_p2), 794248  }
   0xd   : > { %s7583_s30 = smov (!%p473_p3, %s6194_s30), 1  ;;  %v6993_v53 = vld [vmem:[%s7576_s9] sm:$0xff]  ;;  %498 = vst.msk [vmem:[#allocation5 + $0x10] sm:$0xff] %vm493_vm10, %v6787_v0  ;;  %vm2457_vm0 = vcmask 7168  }
   0xe   : > { %s6898_s15 = sshll.u32 %s7583_s30, 4  ;;  %s6810_s30 = smov 110  }
   0xf   : > { %s477_s18 = scalar_lea.vmem %s7567_s0, %s6898_s15  ;;  %s7035_s17 = scalar_lea.vmem %s7568_s1, %s6898_s15 }
  0x10   : > { %v499_v2 = vld [vmem:[%s477_s18] sm:$0xff]  ;;  %v500_v3 = vld [vmem:[%s477_s18 + $0x8] sm:$0xff]  ;;  %s6800_s18 = smov 17  }
  0x11   : > { %502 = vst.msk [vmem:[#allocation2] sm:$0xff] %vm501_vm1, %v499_v2  ;;  %503 = vst.msk [vmem:[#allocation2 + $0x8] sm:$0xff] %vm501_vm1, %v500_v3  ;;  %vm2463_vm1 = vcmask 138248  }
  0x18   : > { %v504_v4 = vld [vmem:[#allocation2] sm:$0xff]  ;;  %v505_v5 = vld [vmem:[#allocation2 + $0x8] sm:$0xff] }
  0x19   : > { %v6762_v6 = vpack.i.bf16 %v505_v5, %v504_v4  ;;  %v6629_v7 = vpack.c.bf16 %v505_v5, %v504_v4 }
  0x1b   : > { %6763 = vrot.lane.b32.xlu0 %v6762_v6, %s6790_s19  ;;  %6773 = vrot.lane.b32.xlu1 %v6762_v6, %s6791_s20  ;;  %s6801_s20 = smov 33  }
  0x1c   : > { %6636 = vmatpush3.bf16.msra.mxu1 %v6629_v7 }
  0x1d   : > { %6640 = vmatprep.subr.bf16.mxu1 %v6788_v1 }
  0x1f   : > { %6768 = vrot.lane.b32.xlu0 %v6762_v6, %s6792_s23  ;;  %6428 = vmatmul.mubr.msk.f32.vlgmr.msra.gmra.mrb[0].mxu1 %vm522_vm3, %v6211_v8  ;;  %v3691_v6 = vld [vmem:[%s7035_s17 + $0x8] sm:$0xff] }
  0x20   : > { %6642 = vmatpush3.bf16.msra.mxu1 %v6629_v7  ;;  %6441 = vmatprep.mubr.msk.f32.mxu1 %vm6789_vm2, %v6787_v0 }
  0x21   : > { %6649 = vmatprep.subr.bf16.mxu1 %v6788_v1  ;;  %1141 = vperm.xlu1 %6777, %v507_v11  }
  0x23   : > { %6442 = vmatmul.mubr.msk.f32.vlgmr.msra.gmra.mrb[2].mxu1 %vm522_vm3, %v6215_v9 }
  0x24   : > { %6651 = vmatpush3.bf16.msra.mxu1 %v6629_v7  ;;  %6462 = vmatprep.mubr.msk.f32.mxu1 %vm6789_vm2, %v6787_v0 }
  0x25   : > { %6465 = vmatprep.subr.mxu1 %v6787_v0 }
  0x27   : > { %6463 = vmatmul.mubr.msk.f32.vlgmr.msra.gmra.mrb[4].mxu1 %vm522_vm3, %v6205_v10 }
  0x28   : > { %6467 = vmatprep.mubr.msk.f32.mxu1 %vm6789_vm2, %v6787_v0  ;;  %6466 = vmatpush3.msra.mxu1 %v6981_v32 }
  0x29   : > { %6470 = vmatprep.subr.mxu1 %v6787_v0 }
  0x8d   : > { %v6764_v13 = vpop.permute.xlu0 %6763  ;;  %v6774_v23 = vpop.permute.xlu1 %6773 }
  0x8e   : > { %v6766_v14 = vunpack.i.h.bf16 %v6764_v13  ;;  %v6765_v15 = vunpack.i.l.bf16 %v6764_v13  ;;  %v6776_v24 = vunpack.i.h.bf16 %v6774_v23  ;;  %v6775_v25 = vunpack.i.l.bf16 %v6774_v23 }
  0x90   : > { %v6626_v16 = vpack.c.bf16 %v6766_v14, %v6765_v15  ;;  %v6644_v27 = vpack.c.bf16 %v6776_v24, %v6775_v25 }
  0x91   : > { %v6769_v17 = vpop.permute.xlu0 %6768 }
  0x92   : > { %6627 = vmatpush3.bf16.msra.mxu0 %v6626_v16  ;;  %v6771_v18 = vunpack.i.h.bf16 %v6769_v17  ;;  %v6770_v19 = vunpack.i.l.bf16 %v6769_v17 }
  0x93   : > { %6628 = vmatprep.subr.bf16.mxu0 %v6788_v1 }
  0x94   : > { %v6632_v21 = vpack.c.bf16 %v6771_v18, %v6770_v19 }
  0x95   : > { %6407 = vmatmul.mubr.msk.f32.vlgmr.msra.gmra.mrb[0].mxu0 %vm522_vm3, %v6207_v20 }
  0x96   : > { %6630 = vmatpush3.bf16.msra.mxu0 %v6629_v7  ;;  %6413 = vmatprep.mubr.msk.f32.mxu0 %vm6789_vm2, %v6787_v0 }
  0x97   : > { %6631 = vmatprep.subr.bf16.mxu0 %v6788_v1 }
  0x99   : > { %6414 = vmatmul.mubr.msk.f32.vlgmr.msra.gmra.mrb[2].mxu0 %vm522_vm3, %v6206_v22 }
  0x9a   : > { %6633 = vmatpush3.bf16.msra.mxu0 %v6632_v21  ;;  %6420 = vmatprep.mubr.msk.f32.mxu0 %vm6789_vm2, %v6787_v0 }
  0x9b   : > { %6637 = vmatprep.subr.bf16.mxu0 %v6788_v1 }
  0x9d   : > { %6421 = vmatmul.mubr.msk.f32.vlgmr.msra.gmra.mrb[4].mxu0 %vm522_vm3, %v6212_v26 }
  0x9e   : > { %6639 = vmatpush3.bf16.msra.mxu0 %v6632_v21  ;;  %6434 = vmatprep.mubr.msk.f32.mxu0 %vm6789_vm2, %v6787_v0 }
  0x9f   : > { %6643 = vmatprep.subr.bf16.mxu0 %v6788_v1 }
  0xa0   : > { %v1142_v43 = vpop.permute.xlu1 %1141 }
  0xa1   : > { %6435 = vmatmul.mubr.msk.f32.vlgmr.msra.gmra.mrb[6].mxu0 %vm522_vm3, %v6216_v28 }
  0xa2   : > { %6645 = vmatpush3.bf16.msra.mxu0 %v6644_v27  ;;  %6448 = vmatprep.mubr.msk.f32.mxu0 %vm6789_vm2, %v6787_v0 }
  0xa3   : > { %6646 = vmatprep.subr.bf16.mxu0 %v6788_v1 }
  0xa5   : > { %6449 = vmatmul.mubr.msk.f32.vlgmr.msra.gmra.mrb[8].mxu0 %vm522_vm3, %v984_v29 }
  0xa6   : > { %6648 = vmatpush3.bf16.msra.mxu0 %v6626_v16  ;;  %6455 = vmatprep.mubr.msk.f32.mxu0 %vm6789_vm2, %v6787_v0 }
  0xa7   : > { %6475 = vmatprep.subr.mxu0 %v6787_v0 }
  0xad   : > { %6456 = vmatmul.mubr.msk.f32.vlgmr.msra.gmra.mrb[8].mxu0 %vm522_vm3, %v6219_v30  ;;  %vm2455_vm3 = vcmask 1048456  }
  0xae   : > { %6477 = vmatprep.mubr.msk.f32.mxu0 %vm6789_vm2, %v6787_v0  ;;  %6476 = vmatpush3.msra.mxu0 %v6981_v32 }
  0xaf   : > { %6480 = vmatprep.subr.mxu0 %v6787_v0 }
  0xf2   : > { %v828_v31 = vpop.f32.mrb[0].mxu1 }
  0xf3   : > { %v6429_v33 = vpop.f32.mrb[1].mxu1 }
  0xf6   : > { %v978_v34 = vpop.f32.mrb[2].mxu1 }
  0xf7   : > { %v6443_v35 = vpop.f32.mrb[3].mxu1 }
  0xfa   : > { %v1213_v36 = vpop.f32.mrb[4].mxu1 }
  0xfb   : > { %v6464_v37 = vpop.f32.mrb[5].mxu1  ;;  %v1214_v46 = vadd.f32 %v1213_v36, %v1142_v43 }
  0xfd   : > { %v1218_v52 = vmul.f32 0.2, %v1214_v46  ;;  %vm1217_vm6 = vcmp.gt.f32.partialorder %v1214_v46, 0.0 }
  0xff   : > { %v1219_v56 = vsel %vm1217_vm6, %v1214_v46, %v1218_v52  ;;  %vm4060_vm6 = vcmask 785408  }
 0x168   : > { %v592_v39 = vpop.f32.mrb[0].mxu0 }
 0x169   : > { %v6408_v40 = vpop.f32.mrb[1].mxu0  ;;  %v602_v41 = vmul.f32 %v6209_v38, %v592_v39 }
 0x16c   : > { %v672_v42 = vpop.f32.mrb[2].mxu0 }
 0x16d   : > { %v673_v44 = vadd.f32 %v672_v42, %v602_v41  ;;  %v6415_v45 = vpop.f32.mrb[3].mxu0 }
 0x16f   : > { %v1220_v47 = vadd.f32 %v1142_v43, %v673_v44 }
 0x170   : > { %v755_v48 = vpop.f32.mrb[4].mxu0 }
 0x171   : > { %vm1221_vm5 = vcmp.gt.f32.partialorder %v1220_v47, 0.0  ;;  %v1222_v49 = vmul.f32 0.2, %v1220_v47  ;;  %v829_v50 = vadd.f32 %v828_v31, %v755_v48  ;;  %v6422_v51 = vpop.f32.mrb[5].mxu0 }
 0x173   : > { %v1223_v54 = vsel %vm1221_vm5, %v1220_v47, %v1222_v49  ;;  %v1224_v63 = vadd.f32 %v1142_v43, %v829_v50  ;;  %vm3882_vm5 = vcmask 916480  }
 0x174   : > { %1539 = vrot.lane.b32.xlu0 %v1223_v54, %s6792_s23  ;;  %v905_v55 = vpop.f32.mrb[6].mxu0  ;;  %6468 = vmatmul.mubr.msk.f32.vlgmr.msra.gmra.mrb[6].mxu1 %vm1234_vm4, %v1223_v54 }
 0x175   : > { %v979_v57 = vadd.f32 %v978_v34, %v905_v55  ;;  %v6436_v58 = vpop.f32.mrb[7].mxu0  ;;  %6471 = vmatpush3.msra.mxu1 %v6993_v53  ;;  %6472 = vmatprep.mubr.msk.f32.mxu1 %vm6789_vm2, %v6787_v0  ;;  %v1226_v3 = vmul.f32 0.2, %v1224_v63  ;;  %vm1225_vm8 = vcmp.gt.f32.partialorder %v1224_v63, 0.0 }
 0x176   : > { %6485 = vmatprep.subr.mxu1 %v6787_v0 }
 0x177   : > { %v1227_v5 = vsel %vm1225_vm8, %v1224_v63, %v1226_v3  ;;  %vm4758_vm8 = vcmask 1031168  }
 0x178   : > { %1613 = vrot.lane.b32.xlu0 %v1219_v56, %s6792_s23 }
 0x17c   : > { %1847 = vrot.lane.b32.xlu0 %v1223_v54, %s6794_s24  ;;  %6473 = vmatmul.mubr.msk.f32.vlgmr.msra.gmra.mrb[6].mxu1 %vm1234_vm4, %v1219_v56 }
 0x17d   : > { %6486 = vmatpush3.msra.mxu1 %v6981_v32  ;;  %6487 = vmatprep.mubr.msk.f32.mxu1 %vm6789_vm2, %v6787_v0 }
 0x17e   : > { %6490 = vmatprep.subr.mxu1 %v6787_v0 }
 0x180   : > { %1921 = vrot.lane.b32.xlu0 %v1219_v56, %s6794_s24  ;;  %v1133_v59 = vpop.f32.mrb[8].mxu0 }
 0x181   : > { %v1137_v60 = vmul.f32 %v6209_v38, %v1133_v59  ;;  %v6457_v61 = vpop.f32.mrb[9].mxu0  ;;  %v3690_v38 = vld [vmem:[%s7035_s17] sm:$0xff]  ;;  %s6808_s17 = smov 126  }
 0x183   : > { %v1138_v62 = vadd.f32 %v1137_v60, %v979_v57 }
 0x184   : > { %2155 = vrot.lane.b32.xlu0 %v1223_v54, %s6795_s25 }
 0x185   : > { %v1228_v1 = vadd.f32 %v1142_v43, %v1138_v62 }
 0x187   : > { %vm1229_vm7 = vcmp.gt.f32.partialorder %v1228_v1, 0.0  ;;  %v1230_v2 = vmul.f32 0.2, %v1228_v1 }
 0x188   : > { %2229 = vrot.lane.b32.xlu0 %v1219_v56, %s6795_s25 }
 0x189   : > { %v1231_v4 = vsel %vm1229_vm7, %v1228_v1, %v1230_v2  ;;  %vm4235_vm7 = vcmask 1039360  }
 0x18a   : > { %1687 = vrot.lane.b32.xlu1 %v1231_v4, %s6792_s23  ;;  %6478 = vmatmul.mubr.msk.f32.vlgmr.msra.gmra.mrb[10].mxu0 %vm1234_vm4, %v1231_v4 }
 0x18b   : > { %6481 = vmatpush3.msra.mxu0 %v6993_v53  ;;  %6482 = vmatprep.mubr.msk.f32.mxu0 %vm6789_vm2, %v6787_v0 }
 0x18c   : > { %2465 = vrot.lane.b32.xlu0 %v1223_v54, %s6796_s26  ;;  %6495 = vmatprep.subr.mxu0 %v6787_v0 }
 0x18e   : > { %1761 = vrot.lane.b32.xlu1 %v1227_v5, %s6792_s23  ;;  %s6798_s23 = smov 80  }
 0x190   : > { %2539 = vrot.lane.b32.xlu0 %v1219_v56, %s6796_s26 }
 0x192   : > { %1995 = vrot.lane.b32.xlu1 %v1231_v4, %s6794_s24  ;;  %6483 = vmatmul.mubr.msk.f32.vlgmr.msra.gmra.mrb[10].mxu0 %vm1234_vm4, %v1227_v5 }
 0x193   : > { %6496 = vmatpush3.msra.mxu0 %v6981_v32  ;;  %6497 = vmatprep.mubr.msk.f32.mxu0 %vm6789_vm2, %v6787_v0 }
 0x194   : > { %2771 = vrot.lane.b32.xlu0 %v1223_v54, %s6797_s27  ;;  %6500 = vmatprep.subr.mxu0 %v6787_v0 }
 0x196   : > { %2069 = vrot.lane.b32.xlu1 %v1227_v5, %s6794_s24 }
 0x198   : > { %2845 = vrot.lane.b32.xlu0 %v1219_v56, %s6797_s27 }
 0x19a   : > { %2303 = vrot.lane.b32.xlu1 %v1231_v4, %s6795_s25 }
 0x19c   : > { %3077 = vrot.lane.b32.xlu0 %v1223_v54, %s6798_s23 }
 0x19e   : > { %2377 = vrot.lane.b32.xlu1 %v1227_v5, %s6795_s25  ;;  %s6804_s25 = smov 65  }
 0x1a0   : > { %3151 = vrot.lane.b32.xlu0 %v1219_v56, %s6798_s23 }
 0x1a2   : > { %2613 = vrot.lane.b32.xlu1 %v1231_v4, %s6796_s26 }
 0x1a4   : > { %3383 = vrot.lane.b32.xlu0 %v1223_v54, %s6799_s28 }
 0x1a6   : > { %2687 = vrot.lane.b32.xlu1 %v1227_v5, %s6796_s26 }
 0x1a8   : > { %3457 = vrot.lane.b32.xlu0 %v1219_v56, %s6799_s28 }
 0x1aa   : > { %2919 = vrot.lane.b32.xlu1 %v1231_v4, %s6797_s27 }
 0x1ac   : > { %3694 = vrot.lane.b32.xlu0 %v3690_v38, %s6800_s18 }
 0x1ae   : > { %2993 = vrot.lane.b32.xlu1 %v1227_v5, %s6797_s27  ;;  %s6805_s27 = smov 113  }
 0x1b2   : > { %3225 = vrot.lane.b32.xlu1 %v1231_v4, %s6798_s23 }
 0x1b6   : > { %3299 = vrot.lane.b32.xlu1 %v1227_v5, %s6798_s23  ;;  %s6806_s23 = smov 1  }
 0x1ba   : > { %3531 = vrot.lane.b32.xlu1 %v1231_v4, %s6799_s28 }
 0x1be   : > { %3605 = vrot.lane.b32.xlu1 %v1227_v5, %s6799_s28  ;;  %s6809_s28 = smov 111  }
 0x1c2   : > { %3696 = vrot.lane.b32.xlu1 %v3691_v6, %s6800_s18 }
 0x1e6   : > { %v1540_v7 = vpop.permute.xlu0 %1539 }
 0x1e7   : > { %6488 = vmatmul.mubr.msk.f32.vlgmr.msra.gmra.mrb[8].mxu1 %vm1234_vm4, %v1540_v7 }
 0x1e8   : > { %6491 = vmatpush3.msra.mxu1 %v6993_v53  ;;  %6492 = vmatprep.mubr.msk.f32.mxu1 %vm6789_vm2, %v6787_v0 }
 0x1e9   : > { %6505 = vmatprep.subr.mxu1 %v6787_v0 }
 0x1ea   : > { %v1614_v8 = vpop.permute.xlu0 %1613 }
 0x1ee   : > { %v1848_v9 = vpop.permute.xlu0 %1847 }
 0x1ef   : > { %6493 = vmatmul.mubr.msk.f32.vlgmr.msra.gmra.mrb[8].mxu1 %vm1234_vm4, %v1614_v8  ;;  %v3712_v8 = vld [vmem:[%s7571_s4] sm:$0xff] }
 0x1f0   : > { %6506 = vmatpush3.msra.mxu1 %v6981_v32  ;;  %6507 = vmatprep.mubr.msk.f32.mxu1 %vm6789_vm2, %v6787_v0 }
 0x1f1   : > { %6510 = vmatprep.subr.mxu1 %v6787_v0 }
 0x1f2   : > { %v1922_v10 = vpop.permute.xlu0 %1921 }
 0x1f3   : > { %6508 = vmatmul.mubr.msk.f32.vlgmr.msra.gmra.mrb[10].mxu1 %vm1234_vm4, %v1848_v9 }
 0x1f4   : > { %6511 = vmatpush3.msra.mxu1 %v6993_v53  ;;  %6512 = vmatprep.mubr.msk.f32.mxu1 %vm6789_vm2, %v6787_v0 }
 0x1f5   : > { %6525 = vmatprep.subr.mxu1 %v6787_v0 }
 0x1f6   : > { %v2156_v12 = vpop.permute.xlu0 %2155 }
 0x1fa   : > { %v2230_v14 = vpop.permute.xlu0 %2229 }
 0x1fb   : > { %6513 = vmatmul.mubr.msk.f32.vlgmr.msra.gmra.mrb[10].mxu1 %vm1234_vm4, %v1922_v10 }
 0x1fc   : > { %v1688_v11 = vpop.permute.xlu1 %1687  ;;  %6526 = vmatpush3.msra.mxu1 %v6981_v32  ;;  %6527 = vmatprep.mubr.msk.f32.mxu1 %vm6789_vm2, %v6787_v0 }
 0x1fd   : > { %6498 = vmatmul.mubr.msk.f32.vlgmr.msra.gmra.mrb[12].mxu0 %vm1234_vm4, %v1688_v11  ;;  %6530 = vmatprep.subr.mxu1 %v6787_v0 }
 0x1fe   : > { %6501 = vmatpush3.msra.mxu0 %v6993_v53  ;;  %6502 = vmatprep.mubr.msk.f32.mxu0 %vm6789_vm2, %v6787_v0  ;;  %v2466_v17 = vpop.permute.xlu0 %2465 }
 0x1ff   : > { %6528 = vmatmul.mubr.msk.f32.vlgmr.msra.gmra.mrb[12].mxu1 %vm1234_vm4, %v2156_v12  ;;  %6515 = vmatprep.subr.mxu0 %v6787_v0 }
 0x200   : > { %v1762_v13 = vpop.permute.xlu1 %1761  ;;  %6531 = vmatpush3.msra.mxu1 %v6993_v53  ;;  %6532 = vmatprep.mubr.msk.f32.mxu1 %vm6789_vm2, %v6787_v0 }
 0x201   : > { %6545 = vmatprep.subr.mxu1 %v6787_v0 }
 0x202   : > { %v2540_v19 = vpop.permute.xlu0 %2539 }
 0x204   : > { %v1996_v15 = vpop.permute.xlu1 %1995 }
 0x205   : > { %6503 = vmatmul.mubr.msk.f32.vlgmr.msra.gmra.mrb[12].mxu0 %vm1234_vm4, %v1762_v13 }
 0x206   : > { %6516 = vmatpush3.msra.mxu0 %v6981_v32  ;;  %6517 = vmatprep.mubr.msk.f32.mxu0 %vm6789_vm2, %v6787_v0  ;;  %v2772_v22 = vpop.permute.xlu0 %2771 }
 0x207   : > { %6533 = vmatmul.mubr.msk.f32.vlgmr.msra.gmra.mrb[12].mxu1 %vm1234_vm4, %v2230_v14  ;;  %6520 = vmatprep.subr.mxu0 %v6787_v0 }
 0x208   : > { %v2070_v16 = vpop.permute.xlu1 %2069  ;;  %6546 = vmatpush3.msra.mxu1 %v6981_v32  ;;  %6547 = vmatprep.mubr.msk.f32.mxu1 %vm6789_vm2, %v6787_v0 }
 0x209   : > { %6518 = vmatmul.mubr.msk.f32.vlgmr.msra.gmra.mrb[14].mxu0 %vm1234_vm4, %v1996_v15  ;;  %6550 = vmatprep.subr.mxu1 %v6787_v0 }
 0x20a   : > { %6521 = vmatpush3.msra.mxu0 %v6993_v53  ;;  %6522 = vmatprep.mubr.msk.f32.mxu0 %vm6789_vm2, %v6787_v0  ;;  %v2846_v24 = vpop.permute.xlu0 %2845 }
 0x20b   : > { %6548 = vmatmul.mubr.msk.f32.vlgmr.msra.gmra.mrb[14].mxu1 %vm1234_vm4, %v2466_v17  ;;  %6535 = vmatprep.subr.mxu0 %v6787_v0 }
 0x20c   : > { %v2304_v18 = vpop.permute.xlu1 %2303  ;;  %6551 = vmatpush3.msra.mxu1 %v6993_v53  ;;  %6552 = vmatprep.mubr.msk.f32.mxu1 %vm6789_vm2, %v6787_v0 }
 0x20d   : > { %6565 = vmatprep.subr.mxu1 %v6787_v0 }
 0x20e   : > { %v3078_v27 = vpop.permute.xlu0 %3077 }
 0x210   : > { %v2378_v20 = vpop.permute.xlu1 %2377 }
 0x211   : > { %6523 = vmatmul.mubr.msk.f32.vlgmr.msra.gmra.mrb[14].mxu0 %vm1234_vm4, %v2070_v16 }
 0x212   : > { %6536 = vmatpush3.msra.mxu0 %v6981_v32  ;;  %6537 = vmatprep.mubr.msk.f32.mxu0 %vm6789_vm2, %v6787_v0  ;;  %v3152_v29 = vpop.permute.xlu0 %3151 }
 0x213   : > { %6553 = vmatmul.mubr.msk.f32.vlgmr.msra.gmra.mrb[14].mxu1 %vm1234_vm4, %v2540_v19  ;;  %6540 = vmatprep.subr.mxu0 %v6787_v0 }
 0x214   : > { %v2614_v21 = vpop.permute.xlu1 %2613  ;;  %6566 = vmatpush3.msra.mxu1 %v6981_v32  ;;  %6567 = vmatprep.mubr.msk.f32.mxu1 %vm6789_vm2, %v6787_v0 }
 0x215   : > { %6538 = vmatmul.mubr.msk.f32.vlgmr.msra.gmra.mrb[16].mxu0 %vm1234_vm4, %v2304_v18  ;;  %6570 = vmatprep.subr.mxu1 %v6787_v0 }
 0x216   : > { %6541 = vmatpush3.msra.mxu0 %v6993_v53  ;;  %6542 = vmatprep.mubr.msk.f32.mxu0 %vm6789_vm2, %v6787_v0  ;;  %v3384_v31 = vpop.permute.xlu0 %3383 }
 0x217   : > { %6568 = vmatmul.mubr.msk.f32.vlgmr.msra.gmra.mrb[16].mxu1 %vm1234_vm4, %v2772_v22  ;;  %6555 = vmatprep.subr.mxu0 %v6787_v0 }
 0x218   : > { %v2688_v23 = vpop.permute.xlu1 %2687  ;;  %6571 = vmatpush3.msra.mxu1 %v6993_v53  ;;  %6572 = vmatprep.mubr.msk.f32.mxu1 %vm6789_vm2, %v6787_v0 }
 0x219   : > { %6585 = vmatprep.subr.mxu1 %v6787_v0 }
 0x21a   : > { %v3458_v35 = vpop.permute.xlu0 %3457 }
 0x21c   : > { %v2920_v25 = vpop.permute.xlu1 %2919 }
 0x21d   : > { %6543 = vmatmul.mubr.msk.f32.vlgmr.msra.gmra.mrb[16].mxu0 %vm1234_vm4, %v2378_v20 }
 0x21e   : > { %6556 = vmatpush3.msra.mxu0 %v6981_v32  ;;  %6557 = vmatprep.mubr.msk.f32.mxu0 %vm6789_vm2, %v6787_v0  ;;  %v3695_v44 = vpop.permute.xlu0 %3694 }
 0x21f   : > { %6573 = vmatmul.mubr.msk.f32.vlgmr.msra.gmra.mrb[16].mxu1 %vm1234_vm4, %v2846_v24  ;;  %6560 = vmatprep.subr.mxu0 %v6787_v0  ;;  %3702 = vst.msk [vmem:[#allocation4] sm:$0xff] %vm493_vm10, %v3695_v44 }
 0x220   : > { %v2994_v26 = vpop.permute.xlu1 %2993  ;;  %6586 = vmatpush3.msra.mxu1 %v6981_v32  ;;  %6587 = vmatprep.mubr.msk.f32.mxu1 %vm6789_vm2, %v6787_v0 }
 0x221   : > { %6558 = vmatmul.mubr.msk.f32.vlgmr.msra.gmra.mrb[18].mxu0 %vm1234_vm4, %v2614_v21  ;;  %6590 = vmatprep.subr.mxu1 %v6787_v0 }
 0x222   : > { %6561 = vmatpush3.msra.mxu0 %v6993_v53  ;;  %6562 = vmatprep.mubr.msk.f32.mxu0 %vm6789_vm2, %v6787_v0 }
 0x223   : > { %6588 = vmatmul.mubr.msk.f32.vlgmr.msra.gmra.mrb[18].mxu1 %vm1234_vm4, %v3078_v27  ;;  %6575 = vmatprep.subr.mxu0 %v6787_v0 }
 0x224   : > { %v3226_v28 = vpop.permute.xlu1 %3225  ;;  %6591 = vmatpush3.msra.mxu1 %v6993_v53  ;;  %6592 = vmatprep.mubr.msk.f32.mxu1 %vm6789_vm2, %v6787_v0 }
 0x225   : > { %6605 = vmatprep.subr.mxu1 %v6787_v0 }
 0x226   : > { %v7196_v50 = vld [vmem:[#allocation4] sm:$0xff] }
 0x228   : > { %v3300_v30 = vpop.permute.xlu1 %3299 }
 0x229   : > { %6563 = vmatmul.mubr.msk.f32.vlgmr.msra.gmra.mrb[18].mxu0 %vm1234_vm4, %v2688_v23 }
 0x22a   : > { %6576 = vmatpush3.msra.mxu0 %v6981_v32  ;;  %6577 = vmatprep.mubr.msk.f32.mxu0 %vm6789_vm2, %v6787_v0 }
 0x22b   : > { %6593 = vmatmul.mubr.msk.f32.vlgmr.msra.gmra.mrb[18].mxu1 %vm1234_vm4, %v3152_v29  ;;  %6580 = vmatprep.subr.mxu0 %v6787_v0 }
 0x22c   : > { %6606 = vmatpush3.msra.mxu1 %v6981_v32  ;;  %6607 = vmatprep.mubr.msk.f32.mxu1 %vm6789_vm2, %v6787_v0  ;;  %v3532_v33 = vpop.permute.xlu1 %3531 }
 0x22d   : > { %6578 = vmatmul.mubr.msk.f32.vlgmr.msra.gmra.mrb[20].mxu0 %vm1234_vm4, %v2920_v25  ;;  %6610 = vmatprep.subr.mxu1 %v6787_v0 }
 0x22e   : > { %6581 = vmatpush3.msra.mxu0 %v6993_v53  ;;  %6582 = vmatprep.mubr.msk.f32.mxu0 %vm6789_vm2, %v6787_v0 }
 0x22f   : > { %6608 = vmatmul.mubr.msk.f32.vlgmr.msra.gmra.mrb[20].mxu1 %vm1234_vm4, %v3384_v31  ;;  %6595 = vmatprep.subr.mxu0 %v6787_v0 }
 0x230   : > { %6611 = vmatpush3.msra.mxu1 %v6993_v53  ;;  %6612 = vmatprep.mubr.msk.f32.mxu1 %vm6789_vm2, %v6787_v0  ;;  %v3606_v34 = vpop.permute.xlu1 %3605 }
 0x234   : > { %v3697_v36 = vpop.permute.xlu1 %3696 }
 0x235   : > { %6583 = vmatmul.mubr.msk.f32.vlgmr.msra.gmra.mrb[20].mxu0 %vm1234_vm4, %v2994_v26  ;;  %3704 = vst.msk [vmem:[#allocation4 + $0x10] sm:$0xff] %vm491_vm9, %v3697_v36  ;;  %v7191_v45 = vsel %vm491_vm9, %v3695_v44, %v3697_v36 }
 0x236   : > { %6596 = vmatpush3.msra.mxu0 %v6981_v32  ;;  %6597 = vmatprep.mubr.msk.f32.mxu0 %vm6789_vm2, %v6787_v0 }
 0x237   : > { %6613 = vmatmul.mubr.msk.f32.vlgmr.msra.gmra.mrb[20].mxu1 %vm1234_vm4, %v3458_v35  ;;  %6600 = vmatprep.subr.mxu0 %v6787_v0 }
 0x238   : > { %3782 = vmatprep.mubr.f32.mxu1 %v6787_v0  ;;  %3718 = vmatprep.subr.mxu1 %v7191_v45 }
 0x239   : > { %6598 = vmatmul.mubr.msk.f32.vlgmr.msra.gmra.mrb[22].mxu0 %vm1234_vm4, %v3226_v28  ;;  %3719 = vmatpush1.msra.mxu1 %v7196_v50 }
 0x23a   : > { %6601 = vmatpush3.msra.mxu0 %v6993_v53  ;;  %6602 = vmatprep.mubr.msk.f32.mxu0 %vm6789_vm2, %v6787_v0 }
 0x23b   : > { %6615 = vmatprep.subr.mxu0 %v6787_v0  ;;  %6255 = vmatmul.mubr.msk.f32.vlgmr.msra.gmra.mrb[22].mxu1 %vm1234_vm4, %v3712_v8 }
 0x23c   : > { %3856 = vmatprep.mubr.f32.mxu1 %v6787_v0  ;;  %v7213_v12 = vld [vmem:[#allocation4 + $0x10] sm:$0xff] }
 0x241   : > { %6603 = vmatmul.mubr.msk.f32.vlgmr.msra.gmra.mrb[22].mxu0 %vm1234_vm4, %v3300_v30  ;;  %v3709_v30 = vld [vmem:[%s7570_s3] sm:$0xff] }
 0x242   : > { %6616 = vmatpush3.msra.mxu0 %v6981_v32  ;;  %6617 = vmatprep.mubr.msk.f32.mxu0 %vm6789_vm2, %v6787_v0 }
 0x243   : > { %6620 = vmatprep.subr.mxu0 %v6787_v0 }
 0x245   : > { %6618 = vmatmul.mubr.msk.f32.vlgmr.msra.gmra.mrb[24].mxu0 %vm1234_vm4, %v3532_v33 }
 0x246   : > { %6621 = vmatpush3.msra.mxu0 %v6993_v53  ;;  %6622 = vmatprep.mubr.msk.f32.mxu0 %vm6789_vm2, %v6787_v0  ;;  %vm2153_vm2 = vcmask 925448  }
 0x24d   : > { %6623 = vmatmul.mubr.msk.f32.vlgmr.msra.gmra.mrb[24].mxu0 %vm1234_vm4, %v3606_v34 }
 0x24e   : > { %4307 = vmatprep.mubr.f32.mxu0 %v6787_v0 }
 0x24f   : > { %v1377_v37 = vpop.f32.mrb[6].mxu1 }
 0x250   : > { %v6474_v39 = vpop.f32.mrb[7].mxu1  ;;  %1528 = vrot.lane.b32.xlu1 %v1377_v37, %s6800_s18 }
 0x265   : > { %v1523_v32 = vpop.f32.mrb[10].mxu0 }
 0x266   : > { %1534 = vrot.lane.b32.xlu1 %v1523_v32, %s6801_s20  ;;  %v6484_v40 = vpop.f32.mrb[11].mxu0  ;;  %v6258_v32 = vld [vmem:[%s7571_s4 + $0x18] sm:$0xff] }
 0x2c2   : > { %v1683_v41 = vpop.f32.mrb[8].mxu1  ;;  %v1529_v42 = vpop.permute.xlu1 %1528 }
 0x2c3   : > { %1532 = vst.msk [vmem:[#allocation3] sm:$0xff] %vm1531_vm11, %v1529_v42  ;;  %v6494_v43 = vpop.f32.mrb[9].mxu1  ;;  %1836 = vrot.lane.b32.xlu1 %v1683_v41, %s6802_s21 }
 0x2ce   : > { %v1991_v46 = vpop.f32.mrb[10].mxu1 }
 0x2cf   : > { %v6514_v47 = vpop.f32.mrb[11].mxu1  ;;  %2144 = vrot.lane.b32.xlu1 %v1991_v46, %s6803_s22 }
 0x2d8   : > { %v1535_v48 = vpop.permute.xlu1 %1534  ;;  %v1831_v49 = vpop.f32.mrb[12].mxu0 }
 0x2d9   : > { %1538 = vst.msk [vmem:[#allocation3] sm:$0xff] %vm1537_vm12, %v1535_v48  ;;  %1842 = vrot.lane.b32.xlu1 %v1831_v49, %s6804_s25  ;;  %v6504_v51 = vpop.f32.mrb[13].mxu0  ;;  %v6266_v48 = vld [vmem:[%s7571_s4 + $0x8] sm:$0xff] }
 0x2da   : > { %v2299_v52 = vpop.f32.mrb[12].mxu1 }
 0x2db   : > { %2452 = vrot.lane.b32.xlu0 %v2299_v52, %s6805_s27  ;;  %v6534_v53 = vpop.f32.mrb[13].mxu1 }
 0x2e4   : > { %v2139_v54 = vpop.f32.mrb[14].mxu0 }
 0x2e5   : > { %v6524_v55 = vpop.f32.mrb[15].mxu0 }
 0x2e6   : > { %v2609_v56 = vpop.f32.mrb[14].mxu1 }
 0x2e7   : > { %2762 = vrot.lane.b32.xlu0 %v2609_v56, %s6800_s18  ;;  %v6554_v57 = vpop.f32.mrb[15].mxu1 }
 0x2f0   : > { %v2447_v58 = vpop.f32.mrb[16].mxu0 }
 0x2f1   : > { %2460 = vrot.lane.b32.xlu1 %v2447_v58, %s6806_s23  ;;  %v6544_v59 = vpop.f32.mrb[17].mxu0  ;;  %v6257_v58 = vld [vmem:[%s7570_s3 + $0x18] sm:$0xff] }
 0x2f2   : > { %v2915_v60 = vpop.f32.mrb[16].mxu1 }
 0x2f3   : > { %3068 = vrot.lane.b32.xlu0 %v2915_v60, %s6802_s21  ;;  %v6574_v61 = vpop.f32.mrb[17].mxu1 }
 0x2fc   : > { %v2757_v62 = vpop.f32.mrb[18].mxu0 }
 0x2fd   : > { %2767 = vrot.lane.b32.xlu0 %v2757_v62, %s6801_s20  ;;  %v6564_v63 = vpop.f32.mrb[19].mxu0  ;;  %s6812_s20 = smov 94  }
 0x2fe   : > { %v3221_v1 = vpop.f32.mrb[18].mxu1  ;;  %v6262_v63 = vld [vmem:[%s7571_s4 + $0x30] sm:$0xff] }
 0x2ff   : > { %v6594_v2 = vpop.f32.mrb[19].mxu1 }
 0x301   : > { %3374 = vrot.lane.b32.xlu0 %v3221_v1, %s6803_s22 }
 0x308   : > { %v3063_v3 = vpop.f32.mrb[20].mxu0 }
 0x309   : > { %3073 = vrot.lane.b32.xlu0 %v3063_v3, %s6804_s25  ;;  %v6584_v4 = vpop.f32.mrb[21].mxu0 }
 0x30a   : > { %v3527_v5 = vpop.f32.mrb[20].mxu1 }
 0x30b   : > { %v6614_v6 = vpop.f32.mrb[21].mxu1  ;;  %3680 = vrot.lane.b32.xlu1 %v3527_v5, %s6805_s27 }
 0x314   : > { %v3369_v7 = vpop.f32.mrb[22].mxu0 }
 0x315   : > { %3379 = vrot.lane.b32.xlu0 %v3369_v7, %s6807_s16  ;;  %v6604_v9 = vpop.f32.mrb[23].mxu0  ;;  %v6261_v7 = vld [vmem:[%s7570_s3 + $0x30] sm:$0xff] }
 0x319   : > { %2150 = vrot.lane.b32.xlu0 %v2139_v54, %s6807_s16  ;;  %s6811_s16 = smov 95  }
 0x31d   : > { %3878 = vrot.lane.b32.xlu0 %v7191_v45, %s6794_s24 }
 0x320   : > { %v3675_v10 = vpop.f32.mrb[24].mxu0 }
 0x321   : > { %3686 = vrot.lane.b32.xlu1 %v3675_v10, %s6806_s23  ;;  %v6624_v11 = vpop.f32.mrb[25].mxu0  ;;  %3876 = vrot.lane.b32.xlu0 %v7196_v50, %s6794_s24 }
 0x325   : > { %4056 = vrot.lane.b32.xlu0 %v7191_v45, %s6796_s26  ;;  %3880 = vrot.lane.b32.xlu1 %v7213_v12, %s6794_s24 }
 0x329   : > { %4054 = vrot.lane.b32.xlu0 %v7196_v50, %s6796_s26  ;;  %4058 = vrot.lane.b32.xlu1 %v7213_v12, %s6796_s26 }
 0x32d   : > { %4231 = vrot.lane.b32.xlu0 %v7191_v45, %s6790_s19  ;;  %4233 = vrot.lane.b32.xlu1 %v7213_v12, %s6790_s19 }
 0x331   : > { %4754 = vrot.lane.b32.xlu0 %v7191_v45, %s6808_s17  ;;  %4756 = vrot.lane.b32.xlu1 %v7213_v12, %s6808_s17 }
 0x335   : > { %v1837_v13 = vpop.permute.xlu1 %1836  ;;  %4229 = vrot.lane.b32.xlu0 %v7196_v50, %s6790_s19  ;;  %4752 = vrot.lane.b32.xlu1 %v7196_v50, %s6808_s17 }
 0x336   : > { %1840 = vst.msk [vmem:[#allocation3] sm:$0xff] %vm1839_vm13, %v1837_v13 }
 0x341   : > { %v2145_v14 = vpop.permute.xlu1 %2144 }
 0x34b   : > { %v1843_v15 = vpop.permute.xlu1 %1842 }
 0x34c   : > { %1846 = vst.msk [vmem:[#allocation3] sm:$0xff] %vm1845_vm14, %v1843_v15 }
 0x34d   : > { %v2453_v16 = vpop.permute.xlu0 %2452  ;;  %2148 = vst.msk [vmem:[#allocation3] sm:$0xff] %vm2147_vm15, %v2145_v14 }
 0x34e   : > { %2458 = vst.msk [vmem:[#allocation3 + $0x8] sm:$0xff] %vm2457_vm0, %v2453_v16 }
 0x359   : > { %v2763_v18 = vpop.permute.xlu0 %2762 }
 0x363   : > { %v2461_v17 = vpop.permute.xlu1 %2460 }
 0x364   : > { %2464 = vst.msk [vmem:[#allocation3 + $0x8] sm:$0xff] %vm2463_vm1, %v2461_v17 }
 0x365   : > { %2765 = vst.msk [vmem:[#allocation3 + $0x8] sm:$0xff] %vm1531_vm11, %v2763_v18  ;;  %v3069_v19 = vpop.permute.xlu0 %3068  ;;  %vm4408_vm11 = vcmask 908288  }
 0x36f   : > { %v2768_v20 = vpop.permute.xlu0 %2767 }
 0x370   : > { %2770 = vst.msk [vmem:[#allocation3 + $0x8] sm:$0xff] %vm1537_vm12, %v2768_v20  ;;  %vm4931_vm12 = vcmask 900096  }
 0x371   : > { %3071 = vst.msk [vmem:[#allocation3 + $0x8] sm:$0xff] %vm1839_vm13, %v3069_v19  ;;  %vm4583_vm13 = vcmask 777216  }
 0x373   : > { %v3375_v21 = vpop.permute.xlu0 %3374 }
 0x37b   : > { %v3074_v22 = vpop.permute.xlu0 %3073 }
 0x37c   : > { %3076 = vst.msk [vmem:[#allocation3 + $0x8] sm:$0xff] %vm1845_vm14, %v3074_v22  ;;  %vm5106_vm14 = vcmask 769024  }
 0x37d   : > { %v3681_v23 = vpop.permute.xlu1 %3680  ;;  %3377 = vst.msk [vmem:[#allocation3 + $0x8] sm:$0xff] %vm2147_vm15, %v3375_v21 }
 0x37e   : > { %3684 = vst.msk [vmem:[#allocation3 + $0x10] sm:$0xff] %vm2457_vm0, %v3681_v23 }
 0x387   : > { %v3380_v24 = vpop.permute.xlu0 %3379 }
 0x388   : > { %3382 = vst.msk [vmem:[#allocation3 + $0x8] sm:$0xff] %vm2153_vm2, %v3380_v24 }
 0x389   : > { %3683 = vst.msk [vmem:[#allocation3 + $0x8] sm:$0xff] %vm2455_vm3, %v3681_v23  ;;  %v6277_v23 = vld [vmem:[%s7570_s3 + $0x10] sm:$0xff] }
 0x38b   : > { %v2151_v25 = vpop.permute.xlu0 %2150 }
 0x38c   : > { %2154 = vst.msk [vmem:[#allocation3] sm:$0xff] %vm2153_vm2, %v2151_v25 }
 0x38d   : > { %2456 = vst.msk [vmem:[#allocation3] sm:$0xff] %vm2455_vm3, %v2453_v16  ;;  %v6265_v16 = vld [vmem:[%s7570_s3 + $0x8] sm:$0xff] }
 0x38f   : > { %v3879_v26 = vpop.permute.xlu0 %3878 }
 0x390   : > { %v7246_v27 = vld [vmem:[#allocation3 + $0x8] sm:$0xff] }
 0x391   : > { %3792 = vmatprep.subr.mxu1 %v7246_v27 }
 0x393   : > { %v3687_v28 = vpop.permute.xlu1 %3686  ;;  %v3877_v29 = vpop.permute.xlu0 %3876 }
 0x394   : > { %3689 = vst.msk [vmem:[#allocation3 + $0x10] sm:$0xff] %vm2463_vm1, %v3687_v28  ;;  %v7253_v31 = vld [vmem:[#allocation3] sm:$0xff]  ;;  %v3883_v33 = vsel %vm3882_vm5, %v3877_v29, %v3879_v26  ;;  %v6270_v29 = vld [vmem:[%s7571_s4 + $0x20] sm:$0xff] }
 0x395   : > { %3793 = vmatpush1.msra.mxu1 %v7253_v31  ;;  %3964 = vrot.lane.b32.xlu1 %v7253_v31, %s6794_s24 }
 0x396   : > { %6256 = vmatmul.mubr.msk.f32.vlgmr.msra.gmra.mrb[22].mxu1 %vm1234_vm4, %v3709_v30 }
 0x397   : > { %v4057_v34 = vpop.permute.xlu0 %4056  ;;  %v3881_v35 = vpop.permute.xlu1 %3880  ;;  %3954 = vmatprep.mubr.f32.mxu1 %v6787_v0 }
 0x398   : > { %v3884_v36 = vsel %vm3882_vm5, %v3879_v26, %v3881_v35 }
 0x399   : > { %4139 = vrot.lane.b32.xlu1 %v7253_v31, %s6796_s26  ;;  %3890 = vmatprep.subr.mxu1 %v3884_v36 }
 0x39a   : > { %3891 = vmatpush1.msra.mxu1 %v3883_v33  ;;  %v6282_v33 = vld [vmem:[%s7571_s4 + $0x28] sm:$0xff] }
 0x39b   : > { %v3867_v37 = vld [vmem:[#allocation3 + $0x10] sm:$0xff]  ;;  %v4055_v38 = vpop.permute.xlu0 %4054  ;;  %v4059_v39 = vpop.permute.xlu1 %4058 }
 0x39c   : > { %3968 = vrot.lane.b32.xlu0 %v3867_v37, %s6794_s24  ;;  %v7269_v40 = vsel %vm4060_vm6, %v4055_v38, %v4057_v34  ;;  %v7272_v41 = vsel %vm4060_vm6, %v4057_v34, %v4059_v39 }
 0x39d   : > { %3966 = vrot.lane.b32.xlu1 %v7246_v27, %s6794_s24 }
 0x39e   : > { %6259 = vmatmul.mubr.msk.f32.vlgmr.msra.gmra.mrb[22].mxu1 %vm1234_vm4, %v6258_v32 }
 0x39f   : > { %v4232_v42 = vpop.permute.xlu0 %4231  ;;  %v4234_v43 = vpop.permute.xlu1 %4233  ;;  %4041 = vmatprep.mubr.f32.mxu1 %v6787_v0 }
 0x3a0   : > { %4316 = vrot.lane.b32.xlu0 %v7246_v27, %s6790_s19  ;;  %v4237_v44 = vsel %vm4235_vm7, %v4232_v42, %v4234_v43 }
 0x3a1   : > { %4141 = vrot.lane.b32.xlu1 %v7246_v27, %s6796_s26  ;;  %4243 = vmatprep.subr.mxu0 %v4237_v44 }
 0x3a3   : > { %v7283_v46 = vpop.permute.xlu0 %4754 }
 0x3a4   : > { %4839 = vrot.lane.b32.xlu0 %v7246_v27, %s6808_s17 }
 0x3a5   : > { %4837 = vrot.lane.b32.xlu1 %v7253_v31, %s6808_s17 }
 0x3a7   : > { %v4230_v47 = vpop.permute.xlu0 %4229 }
 0x3a8   : > { %4314 = vrot.lane.b32.xlu0 %v7253_v31, %s6790_s19  ;;  %v4236_v49 = vsel %vm4235_vm7, %v4230_v47, %v4232_v42  ;;  %v6281_v42 = vld [vmem:[%s7570_s3 + $0x28] sm:$0xff] }
 0x3a9   : > { %4406 = vrot.lane.b32.xlu1 %v7213_v12, %s6809_s28  ;;  %4244 = vmatpush1.msra.mxu0 %v4236_v49  ;;  %v6274_v49 = vld [vmem:[%s7571_s4 + $0x38] sm:$0xff] }
 0x3aa   : > { %6267 = vmatmul.mubr.msk.f32.vlgmr.msra.gmra.mrb[26].mxu0 %vm1234_vm4, %v6266_v48 }
 0x3ab   : > { %4391 = vmatprep.mubr.f32.mxu0 %v6787_v0 }
 0x3ac   : > { %4143 = vrot.lane.b32.xlu0 %v3867_v37, %s6796_s26 }
 0x3ad   : > { %4929 = vrot.lane.b32.xlu1 %v7213_v12, %s6810_s30 }
 0x3b0   : > { %4404 = vrot.lane.b32.xlu0 %v7191_v45, %s6809_s28 }
 0x3b1   : > { %4925 = vrot.lane.b32.xlu1 %v7196_v50, %s6810_s30 }
 0x3b4   : > { %4927 = vrot.lane.b32.xlu0 %v7191_v45, %s6810_s30 }
 0x3b5   : > { %4318 = vrot.lane.b32.xlu1 %v3867_v37, %s6790_s19 }
 0x3b8   : > { %4402 = vrot.lane.b32.xlu0 %v7196_v50, %s6809_s28 }
 0x3b9   : > { %4841 = vrot.lane.b32.xlu1 %v3867_v37, %s6808_s17 }
 0x3bc   : > { %4489 = vrot.lane.b32.xlu0 %v7246_v27, %s6809_s28 }
 0x3bd   : > { %5010 = vrot.lane.b32.xlu1 %v7253_v31, %s6810_s30 }
 0x3c0   : > { %5012 = vrot.lane.b32.xlu0 %v7246_v27, %s6810_s30 }
 0x3c1   : > { %4581 = vrot.lane.b32.xlu1 %v7213_v12, %s6811_s16 }
 0x3c4   : > { %4487 = vrot.lane.b32.xlu0 %v7253_v31, %s6809_s28 }
 0x3c5   : > { %4491 = vrot.lane.b32.xlu1 %v3867_v37, %s6809_s28 }
 0x3c8   : > { %4579 = vrot.lane.b32.xlu0 %v7191_v45, %s6811_s16 }
 0x3c9   : > { %5014 = vrot.lane.b32.xlu1 %v3867_v37, %s6810_s30 }
 0x3cc   : > { %5102 = vrot.lane.b32.xlu0 %v7191_v45, %s6812_s20  ;;  %v3707_v45 = vld [vmem:[%s7574_s7] sm:$0xff] }
 0x3cd   : > { %5104 = vrot.lane.b32.xlu1 %v7213_v12, %s6812_s20  ;;  %v6278_v12 = vld [vmem:[%s7571_s4 + $0x10] sm:$0xff] }
 0x3d0   : > { %4577 = vrot.lane.b32.xlu0 %v7196_v50, %s6811_s16 }
 0x3d1   : > { %5100 = vrot.lane.b32.xlu1 %v7196_v50, %s6812_s20  ;;  %v4757_v50 = vpop.permute.xlu1 %4756 }
 0x3d2   : > { %v4760_v8 = vsel %vm4758_vm8, %v7283_v46, %v4757_v50 }
 0x3d4   : > { %4664 = vrot.lane.b32.xlu0 %v7246_v27, %s6811_s16 }
 0x3d5   : > { %4666 = vrot.lane.b32.xlu1 %v3867_v37, %s6811_s16  ;;  %v4753_v51 = vpop.permute.xlu1 %4752 }
 0x3d6   : > { %v4759_v10 = vsel %vm4758_vm8, %v4753_v51, %v7283_v46 }
 0x3d8   : > { %5187 = vrot.lane.b32.xlu0 %v7246_v27, %s6812_s20 }
 0x3d9   : > { %5189 = vrot.lane.b32.xlu1 %v3867_v37, %s6812_s20  ;;  %v6269_v37 = vld [vmem:[%s7570_s3 + $0x20] sm:$0xff] }
 0x3dc   : > { %4662 = vrot.lane.b32.xlu0 %v7253_v31, %s6811_s16 }
 0x3dd   : > { %5185 = vrot.lane.b32.xlu1 %v7253_v31, %s6812_s20 }
 0x3e0   : > { %5303 = vperm.xlu0 %6778, %v3707_v45  }
 0x407   : > { %v3965_v52 = vpop.permute.xlu1 %3964 }
 0x40b   : > { %v4140_v53 = vpop.permute.xlu1 %4139 }
 0x40e   : > { %v3969_v54 = vpop.permute.xlu0 %3968 }
 0x40f   : > { %v3967_v55 = vpop.permute.xlu1 %3966 }
 0x410   : > { %v3970_v56 = vsel %vm3882_vm5, %v3965_v52, %v3967_v55  ;;  %v3971_v57 = vsel %vm3882_vm5, %v3967_v55, %v3969_v54  ;;  %v6286_v52 = vld [vmem:[%s7571_s4 + $0x40] sm:$0xff] }
 0x411   : > { %3977 = vmatprep.subr.mxu1 %v3971_v57 }
 0x412   : > { %v4317_v59 = vpop.permute.xlu0 %4316  ;;  %3978 = vmatpush1.msra.mxu1 %v3970_v56 }
 0x413   : > { %6260 = vmatmul.mubr.msk.f32.vlgmr.msra.gmra.mrb[22].mxu1 %vm1234_vm4, %v6257_v58  ;;  %4068 = vmatprep.subr.mxu1 %v7272_v41  ;;  %v4142_v60 = vpop.permute.xlu1 %4141 }
 0x414   : > { %4069 = vmatpush1.msra.mxu1 %v7269_v40  ;;  %4132 = vmatprep.mubr.f32.mxu1 %v6787_v0  ;;  %v4145_v6 = vsel %vm4060_vm6, %v4140_v53, %v4142_v60 }
 0x416   : > { %v4840_v61 = vpop.permute.xlu0 %4839 }
 0x417   : > { %v4838_v62 = vpop.permute.xlu1 %4837 }
 0x418   : > { %v4843_v24 = vsel %vm4758_vm8, %v4838_v62, %v4840_v61 }
 0x41a   : > { %v4315_v1 = vpop.permute.xlu0 %4314 }
 0x41b   : > { %6263 = vmatmul.mubr.msk.f32.vlgmr.msra.gmra.mrb[22].mxu1 %vm1234_vm4, %v6262_v63  ;;  %v4407_v2 = vpop.permute.xlu1 %4406  ;;  %v4320_v17 = vsel %vm4235_vm7, %v4315_v1, %v4317_v59  ;;  %v6285_v63 = vld [vmem:[%s7570_s3 + $0x40] sm:$0xff] }
 0x41c   : > { %4216 = vmatprep.mubr.f32.mxu1 %v6787_v0 }
 0x41e   : > { %v4144_v3 = vpop.permute.xlu0 %4143 }
 0x41f   : > { %v4930_v4 = vpop.permute.xlu1 %4929  ;;  %v4146_v5 = vsel %vm4060_vm6, %v4142_v60, %v4144_v3  ;;  %v6273_v60 = vld [vmem:[%s7570_s3 + $0x38] sm:$0xff] }
 0x420   : > { %4152 = vmatprep.subr.mxu1 %v4146_v5 }
 0x421   : > { %4153 = vmatpush1.msra.mxu1 %v4145_v6 }
 0x422   : > { %v4405_v9 = vpop.permute.xlu0 %4404  ;;  %4766 = vmatprep.subr.mxu1 %v4760_v8 }
 0x423   : > { %6264 = vmatmul.mubr.msk.f32.vlgmr.msra.gmra.mrb[22].mxu1 %vm1234_vm4, %v6261_v7  ;;  %v4926_v11 = vpop.permute.xlu1 %4925  ;;  %v4410_v19 = vsel %vm4408_vm11, %v4405_v9, %v4407_v2  ;;  %v3705_v7 = vld [vmem:[%s7579_s12] sm:$0x3] }
 0x424   : > { %4767 = vmatpush1.msra.mxu1 %v4759_v10  ;;  %4830 = vmatprep.mubr.f32.mxu1 %v6787_v0  ;;  %v3706_v10 = vld [vmem:[%s7580_s13] sm:$0x3] }
 0x426   : > { %v4928_v13 = vpop.permute.xlu0 %4927 }
 0x427   : > { %v4319_v14 = vpop.permute.xlu1 %4318  ;;  %6279 = vmatmul.mubr.msk.f32.vlgmr.msra.gmra.mrb[24].mxu1 %vm1234_vm4, %v6278_v12  ;;  %v4933_v26 = vsel %vm4931_vm12, %v4928_v13, %v4930_v4  ;;  %v4932_v27 = vsel %vm4931_vm12, %v4926_v11, %v4928_v13  ;;  %v5272_v4 = vlaneseq }
 0x428   : > { %v4321_v15 = vsel %vm4235_vm7, %v4317_v59, %v4319_v14  ;;  %4914 = vmatprep.mubr.f32.mxu1 %v6787_v0 }
 0x429   : > { %4327 = vmatprep.subr.mxu0 %v4321_v15  ;;  %v5273_v5 = vshrl.u32 %v5272_v4, 7  ;;  %v6295_v4 = vld [vmem:[%s7572_s5 + $0x20] sm:$0xff] }
 0x42a   : > { %v4403_v18 = vpop.permute.xlu0 %4402  ;;  %4328 = vmatpush1.msra.mxu0 %v4320_v17 }
 0x42b   : > { %v4409_v20 = vsel %vm4408_vm11, %v4403_v18, %v4405_v9  ;;  %4416 = vmatprep.subr.mxu0 %v4410_v19  ;;  %v4842_v21 = vpop.permute.xlu1 %4841  ;;  %6268 = vmatmul.mubr.msk.f32.vlgmr.msra.gmra.mrb[26].mxu0 %vm1234_vm4, %v6265_v16  ;;  %v5274_v6 = vsub.s32 0, %v5273_v5  ;;  %v5278_v8 = vsub.s32 1, %v5273_v5 }
 0x42c   : > { %4417 = vmatpush1.msra.mxu0 %v4409_v20  ;;  %v4844_v22 = vsel %vm4758_vm8, %v4840_v61, %v4842_v21  ;;  %4480 = vmatprep.mubr.f32.mxu0 %v6787_v0 }
 0x42d   : > { %4850 = vmatprep.subr.mxu1 %v4844_v22  ;;  %v7450_v9 = vrot.slane %v3705_v7, %v5274_v6  ;;  %v7455_v11 = vrot.slane %v3705_v7, %v5278_v8  ;;  %v7457_v12 = vrot.slane %v3706_v10, %v5274_v6  ;;  %v7460_v14 = vrot.slane %v3706_v10, %v5278_v8 }
 0x42e   : > { %v4490_v25 = vpop.permute.xlu0 %4489  ;;  %4851 = vmatpush1.msra.mxu1 %v4843_v24 }
 0x42f   : > { %4939 = vmatprep.subr.mxu1 %v4933_v26  ;;  %v5011_v28 = vpop.permute.xlu1 %5010  ;;  %6280 = vmatmul.mubr.msk.f32.vlgmr.msra.gmra.mrb[24].mxu1 %vm1234_vm4, %v6277_v23 }
 0x430   : > { %4940 = vmatpush1.msra.mxu1 %v4932_v27  ;;  %5003 = vmatprep.mubr.f32.mxu1 %v6787_v0 }
 0x432   : > { %v5013_v30 = vpop.permute.xlu0 %5012 }
 0x433   : > { %v4582_v31 = vpop.permute.xlu1 %4581  ;;  %6271 = vmatmul.mubr.msk.f32.vlgmr.msra.gmra.mrb[26].mxu0 %vm1234_vm4, %v6270_v29  ;;  %v5016_v43 = vsel %vm4931_vm12, %v5011_v28, %v5013_v30 }
 0x434   : > { %4564 = vmatprep.mubr.f32.mxu0 %v6787_v0 }
 0x436   : > { %v4488_v34 = vpop.permute.xlu0 %4487 }
 0x437   : > { %v4492_v35 = vpop.permute.xlu1 %4491  ;;  %6283 = vmatmul.mubr.msk.f32.vlgmr.msra.gmra.mrb[24].mxu1 %vm1234_vm4, %v6282_v33  ;;  %v4493_v38 = vsel %vm4408_vm11, %v4488_v34, %v4490_v25 }
 0x438   : > { %v4494_v36 = vsel %vm4408_vm11, %v4490_v25, %v4492_v35  ;;  %5087 = vmatprep.mubr.f32.mxu1 %v6787_v0 }
 0x439   : > { %4500 = vmatprep.subr.mxu0 %v4494_v36 }
 0x43a   : > { %v4580_v39 = vpop.permute.xlu0 %4579  ;;  %4501 = vmatpush1.msra.mxu0 %v4493_v38 }
 0x43b   : > { %v5015_v32 = vpop.permute.xlu1 %5014  ;;  %v4585_v40 = vsel %vm4583_vm13, %v4580_v39, %v4582_v31  ;;  %6272 = vmatmul.mubr.msk.f32.vlgmr.msra.gmra.mrb[26].mxu0 %vm1234_vm4, %v6269_v37 }
 0x43c   : > { %4591 = vmatprep.subr.mxu0 %v4585_v40  ;;  %v5017_v41 = vsel %vm4931_vm12, %v5013_v30, %v5015_v32  ;;  %4655 = vmatprep.mubr.f32.mxu0 %v6787_v0 }
 0x43d   : > { %5023 = vmatprep.subr.mxu1 %v5017_v41 }
 0x43e   : > { %v5103_v44 = vpop.permute.xlu0 %5102  ;;  %5024 = vmatpush1.msra.mxu1 %v5016_v43 }
 0x43f   : > { %v5105_v46 = vpop.permute.xlu1 %5104  ;;  %6284 = vmatmul.mubr.msk.f32.vlgmr.msra.gmra.mrb[24].mxu1 %vm1234_vm4, %v6281_v42 }
 0x440   : > { %v5108_v47 = vsel %vm5106_vm14, %v5103_v44, %v5105_v46  ;;  %5178 = vmatprep.mubr.f32.mxu1 %v6787_v0 }
 0x441   : > { %5114 = vmatprep.subr.mxu1 %v5108_v47 }
 0x442   : > { %v4578_v48 = vpop.permute.xlu0 %4577 }
 0x443   : > { %v4584_v45 = vsel %vm4583_vm13, %v4578_v48, %v4580_v39  ;;  %v5101_v50 = vpop.permute.xlu1 %5100  ;;  %v3708_v39 = vld [vmem:[%s7575_s8] sm:$0xff] }
 0x444   : > { %v5107_v51 = vsel %vm5106_vm14, %v5101_v50, %v5103_v44  ;;  %4592 = vmatpush1.msra.mxu0 %v4584_v45  ;;  %v6289_v44 = vld [vmem:[%s7572_s5 + $0x18] sm:$0xff]  ;;  %v5327_v45 = vld [vmem:[%s7572_s5] sm:$0xff] }
 0x445   : > { %5115 = vmatpush1.msra.mxu1 %v5107_v51  ;;  %6275 = vmatmul.mubr.msk.f32.vlgmr.msra.gmra.mrb[26].mxu0 %vm1234_vm4, %v6274_v49 }
 0x446   : > { %v4665_v53 = vpop.permute.xlu0 %4664  ;;  %4739 = vmatprep.mubr.f32.mxu0 %v6787_v0 }
 0x447   : > { %v4667_v54 = vpop.permute.xlu1 %4666  ;;  %6287 = vmatmul.mubr.msk.f32.vlgmr.msra.gmra.mrb[24].mxu1 %vm1234_vm4, %v6286_v52 }
 0x448   : > { %v4669_v55 = vsel %vm4583_vm13, %v4665_v53, %v4667_v54  ;;  %5262 = vmatprep.mubr.f32.mxu1 %v6787_v0 }
 0x449   : > { %4675 = vmatprep.subr.mxu0 %v4669_v55 }
 0x44a   : > { %v5188_v56 = vpop.permute.xlu0 %5187 }
 0x44b   : > { %v5190_v57 = vpop.permute.xlu1 %5189 }
 0x44c   : > { %v5192_v58 = vsel %vm5106_vm14, %v5188_v56, %v5190_v57 }
 0x44d   : > { %5198 = vmatprep.subr.mxu1 %v5192_v58 }
 0x44e   : > { %v4663_v59 = vpop.permute.xlu0 %4662 }
 0x44f   : > { %v4668_v61 = vsel %vm4583_vm13, %v4663_v59, %v4665_v53  ;;  %v5186_v62 = vpop.permute.xlu1 %5185 }
 0x450   : > { %v5191_v1 = vsel %vm5106_vm14, %v5186_v62, %v5188_v56  ;;  %4676 = vmatpush1.msra.mxu0 %v4668_v61  ;;  %v6301_v62 = vld [vmem:[%s7572_s5 + $0x28] sm:$0xff] }
 0x451   : > { %6276 = vmatmul.mubr.msk.f32.vlgmr.msra.gmra.mrb[26].mxu0 %vm1234_vm4, %v6273_v60  ;;  %5199 = vmatpush1.msra.mxu1 %v5191_v1  ;;  %v6292_v60 = vld [vmem:[%s7572_s5 + $0x30] sm:$0xff] }
 0x452   : > { %6288 = vmatmul.mubr.msk.f32.vlgmr.msra.gmra.mrb[24].mxu1 %vm1234_vm4, %v6285_v63  ;;  %5415 = vmatprep.mubr.f32.mxu0 %v6787_v0 }
 0x453   : > { %5925 = vmatprep.mubr.f32.mxu1 %v6787_v0 }
 0x45f   : > { %v5304_v24 = vpop.permute.xlu0 %5303 }
 0x4f6   : > { %v4218_v2 = vpop.f32.mrb[22].mxu1 }
 0x4f7   : > { %v4220_v3 = vpop.f32.mrb[23].mxu1  ;;  %v5282_v13 = vmul.f32 %v7450_v9, %v4218_v2 }
 0x4f8   : > { %v5283_v15 = vmul.f32 %v7455_v11, %v4220_v3 }
 0x524   : > { %v4741_v16 = vpop.f32.mrb[26].mxu0 }
 0x525   : > { %v5284_v17 = vadd.f32 %v5282_v13, %v4741_v16  ;;  %v4743_v18 = vpop.f32.mrb[27].mxu0  ;;  %v5264_v19 = vpop.f32.mrb[24].mxu1 }
 0x526   : > { %v5285_v20 = vadd.f32 %v5283_v15, %v4743_v18  ;;  %v5297_v21 = vmul.f32 %v7457_v12, %v5264_v19  ;;  %v5266_v22 = vpop.f32.mrb[25].mxu1  ;;  %v6300_v15 = vld [vmem:[%s7572_s5 + $0x10] sm:$0xff] }
 0x527   : > { %v5298_v23 = vmul.f32 %v7460_v14, %v5266_v22 }
 0x528   : > { %v5299_v25 = vadd.f32 %v5297_v21, %v5284_v17  ;;  %v6294_v17 = vld [vmem:[%s7572_s5 + $0x8] sm:$0xff] }
 0x529   : > { %v5300_v26 = vadd.f32 %v5298_v23, %v5285_v20 }
 0x52a   : > { %v5306_v27 = vadd.f32 %v5304_v24, %v5299_v25  ;;  %v6298_v25 = vld [vmem:[%s7572_s5 + $0x38] sm:$0xff] }
 0x52b   : > { %v5307_v28 = vadd.f32 %v5304_v24, %v5300_v26 }
 0x52c   : > { %v5310_v29 = vmul.f32 0.2, %v5306_v27  ;;  %vm5308_vm15 = vcmp.gt.f32.partialorder %v5306_v27, 0.0 }
 0x52d   : > { %v5311_v30 = vmul.f32 0.2, %v5307_v28  ;;  %vm5309_vm0 = vcmp.gt.f32.partialorder %v5307_v28, 0.0 }
 0x52e   : > { %v5312_v31 = vsel %vm5308_vm15, %v5306_v27, %v5310_v29 }
 0x52f   : > { %5316 = vrot.lane.b32.xlu1 %v5312_v31, %s6800_s18  ;;  %v5313_v33 = vsel %vm5309_vm0, %v5307_v28, %v5311_v30 }
 0x533   : > { %5318 = vrot.lane.b32.xlu1 %v5313_v33, %s6800_s18 }
 0x5a1   : > { %v5317_v34 = vpop.permute.xlu1 %5316 }
 0x5a2   : > { %5324 = vst.msk [vmem:[#allocation5] sm:$0xff] %vm493_vm10, %v5317_v34 }
 0x5a5   : > { %v5319_v35 = vpop.permute.xlu1 %5318 }
 0x5a6   : > { %v5320_v36 = vsel %vm491_vm9, %v5317_v34, %v5319_v35  ;;  %5326 = vst.msk [vmem:[#allocation5 + $0x10] sm:$0xff] %vm491_vm9, %v5319_v35 }
 0x5a9   : > { %v5332_v37 = vld [vmem:[#allocation5] sm:$0xff] }
 0x5aa   : > { %5338 = vrot.lane.b32.xlu0 %v5332_v37, %s6794_s24 }
 0x5ad   : > { %v5334_v38 = vld [vmem:[#allocation5 + $0x10] sm:$0xff] }
 0x5ae   : > { %5342 = vrot.lane.b32.xlu1 %v5334_v38, %s6794_s24  ;;  %5340 = vrot.lane.b32.xlu0 %v5320_v36, %s6794_s24 }
 0x5b2   : > { %5498 = vrot.lane.b32.xlu1 %v5332_v37, %s6796_s26  ;;  %5502 = vrot.lane.b32.xlu0 %v5334_v38, %s6796_s26 }
 0x5b6   : > { %5592 = vrot.lane.b32.xlu1 %v5334_v38, %s6809_s28  ;;  %5588 = vrot.lane.b32.xlu0 %v5332_v37, %s6809_s28 }
 0x5ba   : > { %5852 = vrot.lane.b32.xlu1 %v5334_v38, %s6810_s30  ;;  %5672 = vrot.lane.b32.xlu0 %v5332_v37, %s6790_s19 }
 0x5be   : > { %5848 = vrot.lane.b32.xlu1 %v5332_v37, %s6810_s30  ;;  %5590 = vrot.lane.b32.xlu0 %v5320_v36, %s6809_s28 }
 0x5c2   : > { %5500 = vrot.lane.b32.xlu1 %v5320_v36, %s6796_s26  ;;  %5850 = vrot.lane.b32.xlu0 %v5320_v36, %s6810_s30 }
 0x5c6   : > { %5676 = vrot.lane.b32.xlu1 %v5334_v38, %s6790_s19  ;;  %5674 = vrot.lane.b32.xlu0 %v5320_v36, %s6790_s19 }
 0x5ca   : > { %5936 = vrot.lane.b32.xlu1 %v5334_v38, %s6808_s17  ;;  %5934 = vrot.lane.b32.xlu0 %v5320_v36, %s6808_s17 }
 0x5ce   : > { %5932 = vrot.lane.b32.xlu1 %v5332_v37, %s6808_s17  ;;  %5760 = vrot.lane.b32.xlu0 %v5320_v36, %s6811_s16 }
 0x5d2   : > { %5762 = vrot.lane.b32.xlu1 %v5334_v38, %s6811_s16  ;;  %6020 = vrot.lane.b32.xlu0 %v5320_v36, %s6812_s20 }
 0x5d6   : > { %6022 = vrot.lane.b32.xlu1 %v5334_v38, %s6812_s20  ;;  %5758 = vrot.lane.b32.xlu0 %v5332_v37, %s6811_s16 }
 0x5da   : > { %6018 = vrot.lane.b32.xlu1 %v5332_v37, %s6812_s20  ;;  %6114 = vperm.xlu0 %6778, %v3708_v39   ;;  %s487_s20 = scalar_lea.vmem %s7581_s14, %s6898_s15 }
 0x61c   : > { %v5339_v32 = vpop.permute.xlu0 %5338 }
 0x620   : > { %v5343_v40 = vpop.permute.xlu1 %5342  ;;  %v5341_v41 = vpop.permute.xlu0 %5340 }
 0x621   : > { %v5344_v42 = vsel %vm3882_vm5, %v5339_v32, %v5341_v41  ;;  %v5345_v43 = vsel %vm3882_vm5, %v5341_v41, %v5343_v40 }
 0x622   : > { %5351 = vmatprep.subr.mxu0 %v5345_v43 }
 0x623   : > { %5352 = vmatpush1.msra.mxu0 %v5344_v42 }
 0x624   : > { %v5499_v46 = vpop.permute.xlu1 %5498  ;;  %v5503_v47 = vpop.permute.xlu0 %5502  ;;  %5425 = vmatprep.subr.mxu0 %v5320_v36  ;;  %6290 = vmatmul.mubr.msk.f32.vlgmr.msra.gmra.mrb[28].mxu0 %vm1234_vm4, %v6289_v44 }
 0x625   : > { %5426 = vmatpush1.msra.mxu0 %v5332_v37  ;;  %5489 = vmatprep.mubr.f32.mxu0 %v6787_v0 }
 0x628   : > { %v5593_v48 = vpop.permute.xlu1 %5592  ;;  %v5589_v49 = vpop.permute.xlu0 %5588 }
 0x62c   : > { %v5853_v50 = vpop.permute.xlu1 %5852  ;;  %v5673_v51 = vpop.permute.xlu0 %5672  ;;  %6291 = vmatmul.mubr.msk.f32.vlgmr.msra.gmra.mrb[28].mxu0 %vm1234_vm4, %v5327_v45 }
 0x62d   : > { %5575 = vmatprep.mubr.f32.mxu0 %v6787_v0 }
 0x630   : > { %v5849_v52 = vpop.permute.xlu1 %5848  ;;  %v5591_v53 = vpop.permute.xlu0 %5590 }
 0x631   : > { %v5595_v61 = vsel %vm4408_vm11, %v5591_v53, %v5593_v48  ;;  %v5594_v63 = vsel %vm4408_vm11, %v5589_v49, %v5591_v53 }
 0x634   : > { %v5501_v54 = vpop.permute.xlu1 %5500  ;;  %v5851_v55 = vpop.permute.xlu0 %5850 }
 0x635   : > { %v5504_v56 = vsel %vm4060_vm6, %v5499_v46, %v5501_v54  ;;  %v5854_v57 = vsel %vm4931_vm12, %v5849_v52, %v5851_v55  ;;  %v5505_v58 = vsel %vm4060_vm6, %v5501_v54, %v5503_v47  ;;  %v5855_v59 = vsel %vm4931_vm12, %v5851_v55, %v5853_v50 }
 0x636   : > { %5511 = vmatprep.subr.mxu0 %v5505_v58  ;;  %5861 = vmatprep.subr.mxu1 %v5855_v59 }
 0x637   : > { %5512 = vmatpush1.msra.mxu0 %v5504_v56  ;;  %5862 = vmatpush1.msra.mxu1 %v5854_v57 }
 0x638   : > { %v5677_v1 = vpop.permute.xlu1 %5676  ;;  %6293 = vmatmul.mubr.msk.f32.vlgmr.msra.gmra.mrb[28].mxu0 %vm1234_vm4, %v6292_v60  ;;  %5601 = vmatprep.subr.mxu0 %v5595_v61  ;;  %v5675_v2 = vpop.permute.xlu0 %5674 }
 0x639   : > { %5602 = vmatpush1.msra.mxu0 %v5594_v63  ;;  %5665 = vmatprep.mubr.f32.mxu0 %v6787_v0  ;;  %v5679_v3 = vsel %vm4235_vm7, %v5675_v2, %v5677_v1  ;;  %v5678_v5 = vsel %vm4235_vm7, %v5673_v51, %v5675_v2 }
 0x63a   : > { %5685 = vmatprep.subr.mxu0 %v5679_v3  ;;  %6302 = vmatmul.mubr.msk.f32.vlgmr.msra.gmra.mrb[26].mxu1 %vm1234_vm4, %v6301_v62 }
 0x63b   : > { %6009 = vmatprep.mubr.f32.mxu1 %v6787_v0 }
 0x63c   : > { %v5937_v6 = vpop.permute.xlu1 %5936  ;;  %6296 = vmatmul.mubr.msk.f32.vlgmr.msra.gmra.mrb[30].mxu0 %vm1234_vm4, %v6295_v4  ;;  %v5935_v7 = vpop.permute.xlu0 %5934 }
 0x63d   : > { %5686 = vmatpush1.msra.mxu0 %v5678_v5  ;;  %v5939_v8 = vsel %vm4758_vm8, %v5935_v7, %v5937_v6  ;;  %5749 = vmatprep.mubr.f32.mxu0 %v6787_v0 }
 0x63e   : > { %5945 = vmatprep.subr.mxu1 %v5939_v8 }
 0x640   : > { %v5933_v10 = vpop.permute.xlu1 %5932  ;;  %v5761_v13 = vpop.permute.xlu0 %5760 }
 0x641   : > { %v5938_v16 = vsel %vm4758_vm8, %v5933_v10, %v5935_v7 }
 0x642   : > { %5946 = vmatpush1.msra.mxu1 %v5938_v16 }
 0x643   : > { %6303 = vmatmul.mubr.msk.f32.vlgmr.msra.gmra.mrb[26].mxu1 %vm1234_vm4, %v6300_v15 }
 0x644   : > { %v5763_v18 = vpop.permute.xlu1 %5762  ;;  %6297 = vmatmul.mubr.msk.f32.vlgmr.msra.gmra.mrb[30].mxu0 %vm1234_vm4, %v6294_v17  ;;  %v6021_v19 = vpop.permute.xlu0 %6020  ;;  %6095 = vmatprep.mubr.f32.mxu1 %v6787_v0 }
 0x645   : > { %v5765_v20 = vsel %vm4583_vm13, %v5761_v13, %v5763_v18  ;;  %5835 = vmatprep.mubr.f32.mxu0 %v6787_v0  ;;  %v6304_v0 = vld [vmem:[%s7572_s5 + $0x40] sm:$0xff] }
 0x646   : > { %5771 = vmatprep.subr.mxu0 %v5765_v20 }
 0x648   : > { %v6023_v21 = vpop.permute.xlu1 %6022  ;;  %v5759_v22 = vpop.permute.xlu0 %5758 }
 0x649   : > { %v5764_v23 = vsel %vm4583_vm13, %v5759_v22, %v5761_v13  ;;  %v6025_v24 = vsel %vm5106_vm14, %v6021_v19, %v6023_v21 }
 0x64a   : > { %6031 = vmatprep.subr.mxu1 %v6025_v24  ;;  %5772 = vmatpush1.msra.mxu0 %v5764_v23 }
 0x64c   : > { %v6019_v26 = vpop.permute.xlu1 %6018  ;;  %6299 = vmatmul.mubr.msk.f32.vlgmr.msra.gmra.mrb[30].mxu0 %vm1234_vm4, %v6298_v25 }
 0x64d   : > { %v6024_v27 = vsel %vm5106_vm14, %v6019_v26, %v6021_v19 }
 0x64e   : > { %6032 = vmatpush1.msra.mxu1 %v6024_v27 }
 0x64f   : > { %6305 = vmatmul.mubr.msk.f32.vlgmr.msra.gmra.mrb[26].mxu1 %vm1234_vm4, %v6304_v0 }
 0x659   : > { %v6115_v41 = vpop.permute.xlu0 %6114 }
 0x70b   : > { %v5577_v28 = vpop.f32.mrb[28].mxu0 }
 0x70c   : > { %v5579_v29 = vpop.f32.mrb[29].mxu0  ;;  %v6104_v30 = vmul.f32 %v5577_v28, %v7450_v9 }
 0x70d   : > { %v6105_v31 = vmul.f32 %v5579_v29, %v7455_v11 }
 0x71f   : > { %v5837_v33 = vpop.f32.mrb[30].mxu0 }
 0x720   : > { %v6106_v34 = vadd.f32 %v6104_v30, %v5837_v33  ;;  %v5839_v35 = vpop.f32.mrb[31].mxu0 }
 0x721   : > { %v6107_v36 = vadd.f32 %v6105_v31, %v5839_v35 }
 0x722   : > { %v6097_v37 = vpop.f32.mrb[26].mxu1 }
 0x723   : > { %v6108_v38 = vmul.f32 %v6097_v37, %v7457_v12  ;;  %v6099_v39 = vpop.f32.mrb[27].mxu1 }
 0x724   : > { %v6109_v32 = vmul.f32 %v6099_v39, %v7460_v14 }
 0x725   : > { %v6110_v40 = vadd.f32 %v6108_v38, %v6106_v34 }
 0x726   : > { %v6111_v42 = vadd.f32 %v6109_v32, %v6107_v36 }
 0x727   : > { %v6117_v43 = vadd.f32 %v6115_v41, %v6110_v40 }
 0x728   : > { %v6118_v44 = vadd.f32 %v6115_v41, %v6111_v42 }
 0x729   : > { %vm6119_vm4 = vcmp.gt.f32.partialorder %v6117_v43, 0.0  ;;  %v6121_v9 = vmul.f32 0.2, %v6117_v43 }
 0x72a   : > { %vm6120_vm9 = vcmp.gt.f32.partialorder %v6118_v44, 0.0  ;;  %v6122_v11 = vmul.f32 0.2, %v6118_v44 }
 0x72b   : > { %v6123_v46 = vsel %vm6119_vm4, %v6117_v43, %v6121_v9 }
 0x72c   : > { %6125 = vst [vmem:[%s487_s20] sm:$0xff] %v6123_v46  ;;  %v6124_v47 = vsel %vm6120_vm9, %v6118_v44, %v6122_v11 }
 0x72d   : > { %6126 = vst [vmem:[%s487_s20 + $0x8] sm:$0xff] %v6124_v47 }
 0x72e PF: > { %s24_s29 = sadd.s32 1, %s6785_s29  }
 0x72f   : > { %p21_p4 = scmp.ge.s32.totalorder %s24_s29, 4  }
 0x731   :  { %23 = sbr.rel (!%p21_p4) target bundleno = 1 (0x1), region = 141 }

</bundles_post_ra>
